<compile_context>
chip_gen: v6e
topology: v6e:2x2x1
jax: 0.10.0
libtpu: 0.0.40
codegen_flags: <defaults>
</compile_context>

<pallas_src>
import math
import functools

import jax
import jax.numpy as jnp
from jax.experimental import pallas as pl
from jax.experimental.pallas import tpu as pltpu


# ----------------------------------------------------------------------------
# Prep-time weight combination helpers (run once, outside the kernel)
# ----------------------------------------------------------------------------

def _block_diag(a, b):
    r1, c1 = a.shape
    r2, c2 = b.shape
    top = jnp.concatenate([a, jnp.zeros((r1, c2), jnp.float32)], axis=1)
    bot = jnp.concatenate([jnp.zeros((r2, c1), jnp.float32), b], axis=1)
    return jnp.concatenate([top, bot], axis=0)


def _interleave_cols(a, b, group):
    """Interleave columns of a and b in blocks of `group`: (h, slot, j) order."""
    r, c = a.shape
    h = c // group
    a3 = a.reshape(r, h, 1, group)
    b3 = b.reshape(r, h, 1, group)
    return jnp.concatenate([a3, b3], axis=2).reshape(r, 2 * c)


def _interleave_rows(a, b, group):
    """Interleave rows of a and b in blocks of `group`: (h, slot, j) order."""
    r, c = a.shape
    h = r // group
    a3 = a.reshape(h, 1, group, c)
    b3 = b.reshape(h, 1, group, c)
    return jnp.concatenate([a3, b3], axis=1).reshape(2 * r, c)


def _combined_attn(a1, a2, num_heads, cross):
    """Build the combined two-stream MHA weights.

    Layout of the combined activation: rows 0:N = stream1 in lanes 0:d (zeros d:2d),
    rows N:2N = stream2 in lanes d:2d.  Combined QKV output is head-interleaved:
    column (h, slot, j) with slot0 = stream1-side values, slot1 = stream2-side.
    For cross-attention, K/V are routed anti-diagonally (x1 rows produce K2/V2,
    x2 rows produce K1/V1) so one projection serves both directions.
    The 1/sqrt(dh) score scale is folded into the Q weights/biases.
    """
    d = a1['wq'].shape[0]
    dh = d // num_heads
    scale = 1.0 / math.sqrt(dh)
    z = jnp.zeros((d, d), jnp.float32)

    def route_diag(w1, w2):
        return jnp.concatenate([_interleave_cols(w1, z, dh),
                                _interleave_cols(z, w2, dh)], axis=0)

    def route_anti(w1, w2):
        return jnp.concatenate([_interleave_cols(z, w2, dh),
                                _interleave_cols(w1, z, dh)], axis=0)

    wq = route_diag(a1['wq'] * scale, a2['wq'] * scale)
    if cross:
        wk = route_anti(a1['wk'], a2['wk'])
        wv = route_anti(a1['wv'], a2['wv'])
    else:
        wk = route_diag(a1['wk'], a2['wk'])
        wv = route_diag(a1['wv'], a2['wv'])
    w = jnp.concatenate([wq, wk, wv], axis=1)                      # [2d, 6d]

    bq = _interleave_cols(a1['bq'] * scale, a2['bq'] * scale, dh)
    bk = _interleave_cols(a1['bk'], a2['bk'], dh)
    bv = _interleave_cols(a1['bv'], a2['bv'], dh)
    b = jnp.concatenate([bq, bk, bv], axis=1)                      # [1, 6d]

    wo = _interleave_rows(jnp.concatenate([a1['wo'], z], axis=1),
                          jnp.concatenate([z, a2['wo']], axis=1), dh)   # [2d, 2d]
    bo = jnp.concatenate([a1['bo'], a2['bo']], axis=1)             # [1, 2d]
    return w, b, wo, bo


def pack_params(params, num_heads):
    """Combine + pack every static parameter into ONE lane-dense f32 buffer.

    Returns (packed [R, W], layout {name: (row_off, shape)}, coef_stack [L,2,N,N], dims).
    The packed buffer is independent of y and can be cached across forward calls.
    """
    d = params['self1']['emb']['w'].shape[1]
    in1 = params['self1']['emb']['w'].shape[0]
    in2 = params['self2']['emb']['w'].shape[0]
    L = len(params['self1']['layers'])
    N = params['self1']['layers'][0]['coef'].shape[0]
    out_dim = params['cls3']['w'].shape[1]

    leaves = {}

    def add(name, arr):
        arr = jnp.asarray(arr, jnp.float32)
        if arr.ndim == 1:
            arr = arr.reshape(1, -1)
        leaves[name] = arr

    def cat1(a, b):
        return jnp.concatenate([a, b], axis=1)

    # --- self-attention nets, both streams combined ---
    s1, s2 = params['self1'], params['self2']
    add('sa_emb_w', _block_diag(s1['emb']['w'], s2['emb']['w']))
    add('sa_emb_b', cat1(s1['emb']['b'], s2['emb']['b']))
    add('sa_ln_g', cat1(s1['ln']['g'], s2['ln']['g']))
    add('sa_ln_b', cat1(s1['ln']['b'], s2['ln']['b']))
    for l in range(L):
        l1, l2 = s1['layers'][l], s2['layers'][l]
        w, b, wo, bo = _combined_attn(l1['attn'], l2['attn'], num_heads, cross=False)
        add(f'sa{l}_wqkv', w)
        add(f'sa{l}_bqkv', b)
        add(f'sa{l}_wo', wo)
        add(f'sa{l}_bo', bo)
        add(f'sa{l}_ff_w1', _block_diag(l1['ff']['w1'], l2['ff']['w1']))
        add(f'sa{l}_ff_b1', cat1(l1['ff']['b1'], l2['ff']['b1']))
        add(f'sa{l}_ff_w2', _block_diag(l1['ff']['w2'], l2['ff']['w2']))
        add(f'sa{l}_ff_b2', cat1(l1['ff']['b2'], l2['ff']['b2']))
        for nm in ('n1', 'n2', 'n3'):
            add(f'sa{l}_{nm}g', cat1(l1[nm]['g'], l2[nm]['g']))
            add(f'sa{l}_{nm}b', cat1(l1[nm]['b'], l2[nm]['b']))

    # --- cross-attention net, both directions combined ---
    cr = params['cross']
    add('ca_emb_w', _block_diag(cr['emb1']['w'], cr['emb2']['w']))
    add('ca_emb_b', cat1(cr['emb1']['b'], cr['emb2']['b']))
    add('ca_ln_g', cat1(cr['ln1']['g'], cr['ln2']['g']))
    add('ca_ln_b', cat1(cr['ln1']['b'], cr['ln2']['b']))
    for l in range(L):
        a1, a2 = cr['layers1'][l]['attn'], cr['layers2'][l]['attn']
        w, b, wo, bo = _combined_attn(a1, a2, num_heads, cross=True)
        add(f'ca{l}_wqkv', w)
        add(f'ca{l}_bqkv', b)
        add(f'ca{l}_wo', wo)
        add(f'ca{l}_bo', bo)

    # --- fusion + classifier ---
    add('fuse_w', jnp.concatenate([params['fuse_eeg_w'].reshape(-1, 1),
                                   params['fuse_eye_w'].reshape(-1, 1)], axis=0))
    for nm in ('cls1', 'cls2', 'cls3'):
        add(nm + '_w', params[nm]['w'])
        add(nm + '_b', params[nm]['b'])

    # --- pack (lane-dense width, sublane-aligned row offsets) ---
    width = max(a.shape[1] for a in leaves.values())
    width = ((width + 127) // 128) * 128
    layout, off = {}, 0
    for name, arr in leaves.items():
        layout[name] = (off, tuple(arr.shape))
        off += ((arr.shape[0] + 7) // 8) * 8
    rows = max(8, ((off + 7) // 8) * 8)
    buf = jnp.zeros((rows, width), jnp.float32)
    for name, arr in leaves.items():
        o, _ = layout[name]
        buf = buf.at[o:o + arr.shape[0], 0:arr.shape[1]].set(arr)

    coef_stack = jnp.stack(
        [jnp.stack([s1['layers'][l]['coef'], s2['layers'][l]['coef']], axis=0)
         for l in range(L)], axis=0)                               # [L, 2, N, N]
    dims = dict(N=N, d=d, H=num_heads, L=L, out=out_dim, in1=in1, in2=in2)
    return buf, layout, coef_stack, dims


# ----------------------------------------------------------------------------
# The single fused kernel
# ----------------------------------------------------------------------------

def _build_kernel(layout, dims):
    N, d, H, L, out_dim = dims['N'], dims['d'], dims['H'], dims['L'], dims['out']
    dh = d // H
    g = 2 * dh                      # interleaved per-head group width
    twoN, twod = 2 * N, 2 * d
    NEG = -1e30

    def kernel(x_ref, coef_ref, p_ref, out_ref):
        def P(name):
            off, (r, c) = layout[name]
            return p_ref[off:off + r, 0:c]

        # -- masks / score biases, built once from iota (no DMA) --
        row2d = jax.lax.broadcasted_iota(jnp.int32, (twoN, twod), 0)
        lane2d = jax.lax.broadcasted_iota(jnp.int32, (twoN, twod), 1)
        mask_act = jnp.where((row2d < N) == (lane2d < d), 1.0, 0.0)
        rS = jax.lax.broadcasted_iota(jnp.int32, (twoN, twoN), 0)
        cS = jax.lax.broadcasted_iota(jnp.int32, (twoN, twoN), 1)
        same = (rS < N) == (cS < N)
        bias_self = jnp.where(same, 0.0, NEG)    # within-stream attention allowed
        bias_cross = jnp.where(same, NEG, 0.0)   # cross-stream attention allowed

        def ln(x, gname, bname):
            xm = x * mask_act
            mu = jnp.sum(xm, axis=-1, keepdims=True) * (1.0 / d)
            xc = (xm - mu) * mask_act
            var = jnp.sum(xc * xc, axis=-1, keepdims=True) * (1.0 / d)
            return xc * jax.lax.rsqrt(var + 1e-5) * P(gname) + P(bname) * mask_act

        def mha(x, pre, score_bias):
            qkv = jnp.dot(x, P(pre + 'wqkv'),
                          preferred_element_type=jnp.float32) + P(pre + 'bqkv')
            wo = P(pre + 'wo')
            out = None
            for h in range(H):
                q = qkv[:, h * g:(h + 1) * g]
                k = qkv[:, twod + h * g: twod + (h + 1) * g]
                v = qkv[:, 2 * twod + h * g: 2 * twod + (h + 1) * g]
                s = jax.lax.dot_general(q, k, (((1,), (1,)), ((), ())),
                                        preferred_element_type=jnp.float32) + score_bias
                s = s - jnp.max(s, axis=-1, keepdims=True)
                e = jnp.exp(s)
                p_att = e * pl.reciprocal(jnp.sum(e, axis=-1, keepdims=True), approx=True)
                ctx = jnp.dot(p_att, v, preferred_element_type=jnp.float32)
                part = jnp.dot(ctx, wo[h * g:(h + 1) * g, :],
                               preferred_element_type=jnp.float32)
                out = part if out is None else out + part
            return out + P(pre + 'bo')

        def ffn(x, pre):
            h1 = jnp.dot(x, P(pre + 'w1'),
                         preferred_element_type=jnp.float32) + P(pre + 'b1')
            h1 = jnp.maximum(h1, 0.0)
            return jnp.dot(h1, P(pre + 'w2'),
                           preferred_element_type=jnp.float32) + P(pre + 'b2')

        x_in = x_ref[...]                                     # [2N, in1+in2] block layout

        # ---- self-attention nets (both streams batched) ----
        sa = jnp.dot(x_in, P('sa_emb_w'),
                     preferred_element_type=jnp.float32) + P('sa_emb_b')
        sa = ln(sa, 'sa_ln_g', 'sa_ln_b')
        for l in range(L):
            pre = f'sa{l}_'
            h = sa + mha(sa, pre, bias_self)
            h = ln(h, pre + 'n1g', pre + 'n1b')
            h = h + ffn(h, pre + 'ff_')
            h = ln(h, pre + 'n2g', pre + 'n2b')
            h = h + jnp.dot(coef_ref[l], h, preferred_element_type=jnp.float32)
            h = ln(h, pre + 'n3g', pre + 'n3b')
            sa = h + sa                                       # outer residual

        # ---- cross-attention net (both directions batched) ----
        ca = jnp.dot(x_in, P('ca_emb_w'),
                     preferred_element_type=jnp.float32) + P('ca_emb_b')
        ca = ln(ca, 'ca_ln_g', 'ca_ln_b')
        for l in range(L):
            # layer returns x + attn, outer loop re-adds the residual -> 2x + attn
            ca = 2.0 * ca + mha(ca, f'ca{l}_', bias_cross)
        ca = ca * mask_act                                    # clear dead-lane constants

        # ---- attention fusion (both modalities batched; softmax over batch axis) ----
        t = jnp.dot(sa, P('fuse_w'), preferred_element_type=jnp.float32)   # [2N, 1]

        def softmax0(v):
            v = v - jnp.max(v, axis=0, keepdims=True)
            e = jnp.exp(v)
            return e / jnp.sum(e, axis=0, keepdims=True)

        alpha = jnp.concatenate([softmax0(t[0:N]), softmax0(t[N:twoN])], axis=0)
        fused = alpha * sa + (1.0 - alpha) * ca
        res = fused[0:N, :] + fused[N:twoN, :]                # [N, 2d] = [eeg | eye]

        # ---- classifier (exact softmax for parity) ----
        c = jnp.maximum(jnp.dot(res, P('cls1_w'),
                                preferred_element_type=jnp.float32) + P('cls1_b'), 0.0)
        c = jnp.maximum(jnp.dot(c, P('cls2_w'),
                                preferred_element_type=jnp.float32) + P('cls2_b'), 0.0)
        logits = jnp.dot(c, P('cls3_w'),
                         preferred_element_type=jnp.float32) + P('cls3_b')
        logits = logits - jnp.max(logits, axis=-1, keepdims=True)
        e = jnp.exp(logits)
        cls = e / jnp.sum(e, axis=-1, keepdims=True)

        # ---- single lane-dense store ----
        f1 = sa[0:N, 0:d]
        f2 = sa[N:twoN, d:twod]
        f3 = ca[0:N, 0:d]
        f4 = ca[N:twoN, d:twod]
        pieces = [f1, f2, f3, f4, res, cls]
        used = 6 * d + out_dim
        pad = out_ref.shape[-1] - used
        if pad:
            pieces.append(jnp.zeros((N, pad), jnp.float32))
        out_ref[...] = jnp.concatenate(pieces, axis=-1)

    return kernel


# ----------------------------------------------------------------------------
# Wrapper: one pallas_call for the whole forward
# ----------------------------------------------------------------------------

def my_mm_net_forward(packed, coef_stack, x1, x2, y, *, layout, dims):
    N, d, L, out_dim = dims['N'], dims['d'], dims['L'], dims['out']
    in1, in2 = dims['in1'], dims['in2']
    x1 = x1.astype(jnp.float32)
    x2 = x2.astype(jnp.float32)

    # Stacked block-layout input: rows 0:N = x1 (lanes 0:in1), rows N:2N = x2 (lanes in1:).
    x_comb = jnp.zeros((2 * N, in1 + in2), jnp.float32)
    x_comb = x_comb.at[:N, :in1].set(x1).at[N:, in1:].set(x2)

    # SelfExpressionLayer.class_forward: sort by label, ZX = C @ X_sorted, unsort.
    # Absorbed into the coefficient: C_eff = C[inv][:, inv]; block-diag over the 2 streams.
    # (jnp.argsort is stable; torch tie-breaking among equal labels may differ.)
    idx = jnp.argsort(y.reshape(-1))
    inv = jnp.argsort(idx)
    ce = coef_stack[:, :, inv, :][:, :, :, inv]               # [L, 2, N, N]
    coef_dyn = jnp.zeros((L, 2 * N, 2 * N), jnp.float32)
    coef_dyn = coef_dyn.at[:, :N, :N].set(ce[:, 0]).at[:, N:, N:].set(ce[:, 1])

    used = 6 * d + out_dim
    out_lanes = ((max(used, 128) + 127) // 128) * 128

    kernel = _build_kernel(layout, dims)
    slab = pl.pallas_call(
        kernel,
        out_shape=jax.ShapeDtypeStruct((N, out_lanes), jnp.float32),
    )(x_comb, coef_dyn, packed)

    f1 = slab[:, 0 * d:1 * d]
    f2 = slab[:, 1 * d:2 * d]
    f3 = slab[:, 2 * d:3 * d]
    f4 = slab[:, 3 * d:4 * d]
    res_feature = slab[:, 4 * d:6 * d]
    cls = slab[:, 6 * d:6 * d + out_dim]
    return [f1, f2, f3, f4], res_feature, cls, cls


# ----------------------------------------------------------------------------
# Deterministic parameter initialization (synthetic — no checkpoint load),
# mirroring the PyTorch module structure.
# ----------------------------------------------------------------------------

def init_params(key, input_sizes, d_model, num_layers, output_dim, batch_size):
    keys = iter(jax.random.split(key, 1024))
    nk = lambda: next(keys)
    n = output_dim * batch_size
    d = d_model

    def linear(fan_in, fan_out):
        k1, k2 = jax.random.split(nk())
        bound = 1.0 / math.sqrt(fan_in)
        return {'w': jax.random.uniform(k1, (fan_in, fan_out), jnp.float32, -bound, bound),
                'b': jax.random.uniform(k2, (1, fan_out), jnp.float32, -bound, bound)}

    def attn():
        q, k, v, o = linear(d, d), linear(d, d), linear(d, d), linear(d, d)
        return {'wq': q['w'], 'bq': q['b'], 'wk': k['w'], 'bk': k['b'],
                'wv': v['w'], 'bv': v['b'], 'wo': o['w'], 'bo': o['b']}

    def ln():
        return {'g': jnp.ones((1, d), jnp.float32), 'b': jnp.zeros((1, d), jnp.float32)}

    def ffn():
        l1, l2 = linear(d, d), linear(d, d)                   # d_ff == d_model in MyMMNet
        return {'w1': l1['w'], 'b1': l1['b'], 'w2': l2['w'], 'b2': l2['b']}

    def self_layer():
        return {'attn': attn(), 'ff': ffn(), 'n1': ln(), 'n2': ln(), 'n3': ln(),
                'coef': 1e-4 * jnp.ones((n, n), jnp.float32)}  # SelfExpression.Coefficient

    def self_net(in_size):
        return {'emb': linear(in_size, d), 'ln': ln(),
                'layers': [self_layer() for _ in range(num_layers)]}

    def cross_net():
        return {'emb1': linear(input_sizes[0], d), 'emb2': linear(input_sizes[1], d),
                'ln1': ln(), 'ln2': ln(),
                'layers1': [{'attn': attn()} for _ in range(num_layers)],
                'layers2': [{'attn': attn()} for _ in range(num_layers)]}

    return {
        'self1': self_net(input_sizes[0]),
        'self2': self_net(input_sizes[1]),
        'cross': cross_net(),
        'fuse_eeg_w': jax.random.normal(nk(), (d,), jnp.float32),
        'fuse_eye_w': jax.random.normal(nk(), (d,), jnp.float32),
        'cls1': linear(2 * d, 64),
        'cls2': linear(64, 32),
        'cls3': linear(32, output_dim),
    }


# ----------------------------------------------------------------------------
# Demo
# ----------------------------------------------------------------------------

if __name__ == "__main__":
    input_sizes = [12, 20]      # input_size_list
    output_dim = 2              # output_size (number of classes)
    batch_size = 4              # per-class batch -> N = output_dim * batch_size
    d_model = 32
    num_layers = 1              # num_AttLayers
    num_heads = 4
    N = output_dim * batch_size

    key = jax.random.PRNGKey(0)
    k1, k2, kp = jax.random.split(key, 3)
    x1 = jax.random.normal(k1, (N, input_sizes[0]), jnp.float32)
    x2 = jax.random.normal(k2, (N, input_sizes[1]), jnp.float32)
    y = jnp.tile(jnp.arange(output_dim, dtype=jnp.int32), batch_size).reshape(N, 1)

    params = init_params(kp, input_sizes, d_model, num_layers, output_dim, batch_size)
    packed, layout, coef_stack, dims = pack_params(params, num_heads)   # cached across calls

    fwd = jax.jit(functools.partial(my_mm_net_forward, layout=layout, dims=dims))
    f_list, res_feature, cls, cls_dup = fwd(packed, coef_stack, x1, x2, y)
    jax.block_until_ready(cls)

    assert res_feature.shape == (N, 2 * d_model)
    assert cls.shape == (N, output_dim)
    assert all(f.shape == (N, d_model) for f in f_list)
    assert bool(jnp.all(jnp.isfinite(cls)))
    assert bool(jnp.allclose(jnp.sum(cls, axis=-1), 1.0, atol=1e-5))
    print("KERNEL_OK")
</pallas_src>

<mosaic_0001>
module attributes {stable_mosaic.version = 11 : i64} {
  func.func @kernel(%arg0: memref<16x32xf32, #tpu.memory_space<vmem>>, %arg1: memref<1x16x16xf32, #tpu.memory_space<vmem>>, %arg2: memref<840x256xf32, #tpu.memory_space<vmem>>, %arg3: memref<8x256xf32, #tpu.memory_space<vmem>>) attributes {dimension_semantics = [], scalar_prefetch = 0 : i64, scratch_operands = 0 : i64, tpu.core_type = #tpu.core_type<tc>} {
    %0 = tpu.iota {dimensions = array<i32: 0>} : vector<16x64xi32>
    %1 = tpu.iota {dimensions = array<i32: 1>} : vector<16x64xi32>
    %c8_i32 = arith.constant 8 : i32
    %2 = vector.broadcast %c8_i32 : i32 to vector<16x64xi32>
    %3 = arith.cmpi slt, %0, %2 : vector<16x64xi32>
    %c32_i32 = arith.constant 32 : i32
    %4 = vector.broadcast %c32_i32 : i32 to vector<16x64xi32>
    %5 = arith.cmpi slt, %1, %4 : vector<16x64xi32>
    %6 = arith.xori %3, %5 : vector<16x64xi1>
    %cst = arith.constant dense<true> : vector<16x64xi1>
    %7 = arith.xori %6, %cst : vector<16x64xi1>
    %cst_0 = arith.constant 1.000000e+00 : f32
    %cst_1 = arith.constant 0.000000e+00 : f32
    %8 = vector.broadcast %cst_0 : f32 to vector<16x64xf32>
    %9 = vector.broadcast %cst_1 : f32 to vector<16x64xf32>
    %10 = arith.select %7, %8, %9 : vector<16x64xi1>, vector<16x64xf32>
    %11 = tpu.iota {dimensions = array<i32: 0>} : vector<16x16xi32>
    %12 = tpu.iota {dimensions = array<i32: 1>} : vector<16x16xi32>
    %c8_i32_2 = arith.constant 8 : i32
    %13 = vector.broadcast %c8_i32_2 : i32 to vector<16x16xi32>
    %14 = arith.cmpi slt, %11, %13 : vector<16x16xi32>
    %c8_i32_3 = arith.constant 8 : i32
    %15 = vector.broadcast %c8_i32_3 : i32 to vector<16x16xi32>
    %16 = arith.cmpi slt, %12, %15 : vector<16x16xi32>
    %17 = arith.xori %14, %16 : vector<16x16xi1>
    %cst_4 = arith.constant dense<true> : vector<16x16xi1>
    %18 = arith.xori %17, %cst_4 : vector<16x16xi1>
    %cst_5 = arith.constant 0.000000e+00 : f32
    %cst_6 = arith.constant -1.000000e+30 : f32
    %19 = vector.broadcast %cst_5 : f32 to vector<16x16xf32>
    %20 = vector.broadcast %cst_6 : f32 to vector<16x16xf32>
    %21 = arith.select %18, %19, %20 : vector<16x16xi1>, vector<16x16xf32>
    %cst_7 = arith.constant -1.000000e+30 : f32
    %cst_8 = arith.constant 0.000000e+00 : f32
    %22 = vector.broadcast %cst_7 : f32 to vector<16x16xf32>
    %23 = vector.broadcast %cst_8 : f32 to vector<16x16xf32>
    %24 = arith.select %18, %22, %23 : vector<16x16xi1>, vector<16x16xf32>
    %c0 = arith.constant 0 : index
    %c0_9 = arith.constant 0 : index
    %25 = vector.load %arg0[%c0, %c0_9] : memref<16x32xf32, #tpu.memory_space<vmem>>, vector<16x32xf32>
    %c0_10 = arith.constant 0 : index
    %c0_11 = arith.constant 0 : index
    %26 = vector.load %arg2[%c0_10, %c0_11] : memref<840x256xf32, #tpu.memory_space<vmem>>, vector<32x64xf32>
    %cst_12 = arith.constant dense<0.000000e+00> : vector<16x64xf32>
    %27 = tpu.matmul %25, %26, %cst_12 {dimension_numbers = #tpu.dot_dimension_numbers<[1], [0], [0], [1], [0, 0, 1, 1], [], []>} : vector<16x32xf32>, vector<32x64xf32>, vector<16x64xf32> -> vector<16x64xf32>
    %c32 = arith.constant 32 : index
    %c0_13 = arith.constant 0 : index
    %28 = vector.load %arg2[%c32, %c0_13] : memref<840x256xf32, #tpu.memory_space<vmem>>, vector<1x64xf32>
    %29 = vector.broadcast %28 : vector<1x64xf32> to vector<16x64xf32>
    %30 = arith.addf %27, %29 : vector<16x64xf32>
    %31 = arith.mulf %30, %10 : vector<16x64xf32>
    %cst_14 = arith.constant dense<0.000000e+00> : vector<16xf32>
    %32 = vector.multi_reduction <add>, %31, %cst_14 [1] : vector<16x64xf32> to vector<16xf32>
    %33 = vector.shape_cast %32 : vector<16xf32> to vector<16x1xf32>
    %cst_15 = arith.constant 3.125000e-02 : f32
    %34 = vector.broadcast %cst_15 : f32 to vector<16x1xf32>
    %35 = arith.mulf %33, %34 : vector<16x1xf32>
    %36 = vector.broadcast %35 : vector<16x1xf32> to vector<16x64xf32>
    %37 = arith.subf %31, %36 : vector<16x64xf32>
    %38 = arith.mulf %37, %10 : vector<16x64xf32>
    %39 = arith.mulf %38, %38 : vector<16x64xf32>
    %cst_16 = arith.constant dense<0.000000e+00> : vector<16xf32>
    %40 = vector.multi_reduction <add>, %39, %cst_16 [1] : vector<16x64xf32> to vector<16xf32>
    %41 = vector.shape_cast %40 : vector<16xf32> to vector<16x1xf32>
    %cst_17 = arith.constant 3.125000e-02 : f32
    %42 = vector.broadcast %cst_17 : f32 to vector<16x1xf32>
    %43 = arith.mulf %41, %42 : vector<16x1xf32>
    %cst_18 = arith.constant 9.99999974E-6 : f32
    %44 = vector.broadcast %cst_18 : f32 to vector<16x1xf32>
    %45 = arith.addf %43, %44 : vector<16x1xf32>
    %46 = math.rsqrt %45 : vector<16x1xf32>
    %47 = vector.broadcast %46 : vector<16x1xf32> to vector<16x64xf32>
    %48 = arith.mulf %38, %47 : vector<16x64xf32>
    %c40 = arith.constant 40 : index
    %c0_19 = arith.constant 0 : index
    %49 = vector.load %arg2[%c40, %c0_19] : memref<840x256xf32, #tpu.memory_space<vmem>>, vector<1x64xf32>
    %50 = vector.broadcast %49 : vector<1x64xf32> to vector<16x64xf32>
    %51 = arith.mulf %48, %50 : vector<16x64xf32>
    %c48 = arith.constant 48 : index
    %c0_20 = arith.constant 0 : index
    %52 = vector.load %arg2[%c48, %c0_20] : memref<840x256xf32, #tpu.memory_space<vmem>>, vector<1x64xf32>
    %53 = vector.broadcast %52 : vector<1x64xf32> to vector<16x64xf32>
    %54 = arith.mulf %53, %10 : vector<16x64xf32>
    %55 = arith.addf %51, %54 : vector<16x64xf32>
    %c56 = arith.constant 56 : index
    %c0_21 = arith.constant 0 : index
    %56 = vector.load %arg2[%c56, %c0_21] : memref<840x256xf32, #tpu.memory_space<vmem>>, vector<64x192xf32>
    %cst_22 = arith.constant dense<0.000000e+00> : vector<16x192xf32>
    %57 = tpu.matmul %55, %56, %cst_22 {dimension_numbers = #tpu.dot_dimension_numbers<[1], [0], [0], [1], [0, 0, 1, 1], [], []>} : vector<16x64xf32>, vector<64x192xf32>, vector<16x192xf32> -> vector<16x192xf32>
    %c120 = arith.constant 120 : index
    %c0_23 = arith.constant 0 : index
    %58 = vector.load %arg2[%c120, %c0_23] : memref<840x256xf32, #tpu.memory_space<vmem>>, vector<1x192xf32>
    %59 = vector.broadcast %58 : vector<1x192xf32> to vector<16x192xf32>
    %60 = arith.addf %57, %59 : vector<16x192xf32>
    %c128 = arith.constant 128 : index
    %c0_24 = arith.constant 0 : index
    %61 = vector.load %arg2[%c128, %c0_24] : memref<840x256xf32, #tpu.memory_space<vmem>>, vector<64x64xf32>
    %62 = vector.extract_strided_slice %60 {offsets = [0, 0], sizes = [16, 16], strides = [1, 1]} : vector<16x192xf32> to vector<16x16xf32>
    %63 = vector.extract_strided_slice %60 {offsets = [0, 64], sizes = [16, 16], strides = [1, 1]} : vector<16x192xf32> to vector<16x16xf32>
    %64 = vector.extract_strided_slice %60 {offsets = [0, 128], sizes = [16, 16], strides = [1, 1]} : vector<16x192xf32> to vector<16x16xf32>
    %cst_25 = arith.constant dense<0.000000e+00> : vector<16x16xf32>
    %65 = tpu.matmul %62, %63, %cst_25 {dimension_numbers = #tpu.dot_dimension_numbers<[1], [1], [0], [0], [0, 0, 1, 0], [], []>} : vector<16x16xf32>, vector<16x16xf32>, vector<16x16xf32> -> vector<16x16xf32>
    %66 = arith.addf %65, %21 : vector<16x16xf32>
    %cst_26 = arith.constant dense<0xFF800000> : vector<16xf32>
    %67 = vector.multi_reduction <maximumf>, %66, %cst_26 [1] : vector<16x16xf32> to vector<16xf32>
    %68 = vector.shape_cast %67 : vector<16xf32> to vector<16x1xf32>
    %69 = vector.broadcast %68 : vector<16x1xf32> to vector<16x16xf32>
    %70 = arith.subf %66, %69 : vector<16x16xf32>
    %71 = math.exp %70 : vector<16x16xf32>
    %cst_27 = arith.constant dense<0.000000e+00> : vector<16xf32>
    %72 = vector.multi_reduction <add>, %71, %cst_27 [1] : vector<16x16xf32> to vector<16xf32>
    %73 = vector.shape_cast %72 : vector<16xf32> to vector<16x1xf32>
    %74 = tpu.reciprocal %73 {approx = true} : vector<16x1xf32> -> vector<16x1xf32>
    %75 = vector.broadcast %74 : vector<16x1xf32> to vector<16x16xf32>
    %76 = arith.mulf %71, %75 : vector<16x16xf32>
    %cst_28 = arith.constant dense<0.000000e+00> : vector<16x16xf32>
    %77 = tpu.matmul %76, %64, %cst_28 {dimension_numbers = #tpu.dot_dimension_numbers<[1], [0], [0], [1], [0, 0, 1, 1], [], []>} : vector<16x16xf32>, vector<16x16xf32>, vector<16x16xf32> -> vector<16x16xf32>
    %78 = vector.extract_strided_slice %61 {offsets = [0, 0], sizes = [16, 64], strides = [1, 1]} : vector<64x64xf32> to vector<16x64xf32>
    %cst_29 = arith.constant dense<0.000000e+00> : vector<16x64xf32>
    %79 = tpu.matmul %77, %78, %cst_29 {dimension_numbers = #tpu.dot_dimension_numbers<[1], [0], [0], [1], [0, 0, 1, 1], [], []>} : vector<16x16xf32>, vector<16x64xf32>, vector<16x64xf32> -> vector<16x64xf32>
    %80 = vector.extract_strided_slice %60 {offsets = [0, 16], sizes = [16, 16], strides = [1, 1]} : vector<16x192xf32> to vector<16x16xf32>
    %81 = vector.extract_strided_slice %60 {offsets = [0, 80], sizes = [16, 16], strides = [1, 1]} : vector<16x192xf32> to vector<16x16xf32>
    %82 = vector.extract_strided_slice %60 {offsets = [0, 144], sizes = [16, 16], strides = [1, 1]} : vector<16x192xf32> to vector<16x16xf32>
    %cst_30 = arith.constant dense<0.000000e+00> : vector<16x16xf32>
    %83 = tpu.matmul %80, %81, %cst_30 {dimension_numbers = #tpu.dot_dimension_numbers<[1], [1], [0], [0], [0, 0, 1, 0], [], []>} : vector<16x16xf32>, vector<16x16xf32>, vector<16x16xf32> -> vector<16x16xf32>
    %84 = arith.addf %83, %21 : vector<16x16xf32>
    %cst_31 = arith.constant dense<0xFF800000> : vector<16xf32>
    %85 = vector.multi_reduction <maximumf>, %84, %cst_31 [1] : vector<16x16xf32> to vector<16xf32>
    %86 = vector.shape_cast %85 : vector<16xf32> to vector<16x1xf32>
    %87 = vector.broadcast %86 : vector<16x1xf32> to vector<16x16xf32>
    %88 = arith.subf %84, %87 : vector<16x16xf32>
    %89 = math.exp %88 : vector<16x16xf32>
    %cst_32 = arith.constant dense<0.000000e+00> : vector<16xf32>
    %90 = vector.multi_reduction <add>, %89, %cst_32 [1] : vector<16x16xf32> to vector<16xf32>
    %91 = vector.shape_cast %90 : vector<16xf32> to vector<16x1xf32>
    %92 = tpu.reciprocal %91 {approx = true} : vector<16x1xf32> -> vector<16x1xf32>
    %93 = vector.broadcast %92 : vector<16x1xf32> to vector<16x16xf32>
    %94 = arith.mulf %89, %93 : vector<16x16xf32>
    %cst_33 = arith.constant dense<0.000000e+00> : vector<16x16xf32>
    %95 = tpu.matmul %94, %82, %cst_33 {dimension_numbers = #tpu.dot_dimension_numbers<[1], [0], [0], [1], [0, 0, 1, 1], [], []>} : vector<16x16xf32>, vector<16x16xf32>, vector<16x16xf32> -> vector<16x16xf32>
    %96 = vector.extract_strided_slice %61 {offsets = [16, 0], sizes = [16, 64], strides = [1, 1]} : vector<64x64xf32> to vector<16x64xf32>
    %cst_34 = arith.constant dense<0.000000e+00> : vector<16x64xf32>
    %97 = tpu.matmul %95, %96, %cst_34 {dimension_numbers = #tpu.dot_dimension_numbers<[1], [0], [0], [1], [0, 0, 1, 1], [], []>} : vector<16x16xf32>, vector<16x64xf32>, vector<16x64xf32> -> vector<16x64xf32>
    %98 = arith.addf %79, %97 : vector<16x64xf32>
    %99 = vector.extract_strided_slice %60 {offsets = [0, 32], sizes = [16, 16], strides = [1, 1]} : vector<16x192xf32> to vector<16x16xf32>
    %100 = vector.extract_strided_slice %60 {offsets = [0, 96], sizes = [16, 16], strides = [1, 1]} : vector<16x192xf32> to vector<16x16xf32>
    %101 = vector.extract_strided_slice %60 {offsets = [0, 160], sizes = [16, 16], strides = [1, 1]} : vector<16x192xf32> to vector<16x16xf32>
    %cst_35 = arith.constant dense<0.000000e+00> : vector<16x16xf32>
    %102 = tpu.matmul %99, %100, %cst_35 {dimension_numbers = #tpu.dot_dimension_numbers<[1], [1], [0], [0], [0, 0, 1, 0], [], []>} : vector<16x16xf32>, vector<16x16xf32>, vector<16x16xf32> -> vector<16x16xf32>
    %103 = arith.addf %102, %21 : vector<16x16xf32>
    %cst_36 = arith.constant dense<0xFF800000> : vector<16xf32>
    %104 = vector.multi_reduction <maximumf>, %103, %cst_36 [1] : vector<16x16xf32> to vector<16xf32>
    %105 = vector.shape_cast %104 : vector<16xf32> to vector<16x1xf32>
    %106 = vector.broadcast %105 : vector<16x1xf32> to vector<16x16xf32>
    %107 = arith.subf %103, %106 : vector<16x16xf32>
    %108 = math.exp %107 : vector<16x16xf32>
    %cst_37 = arith.constant dense<0.000000e+00> : vector<16xf32>
    %109 = vector.multi_reduction <add>, %108, %cst_37 [1] : vector<16x16xf32> to vector<16xf32>
    %110 = vector.shape_cast %109 : vector<16xf32> to vector<16x1xf32>
    %111 = tpu.reciprocal %110 {approx = true} : vector<16x1xf32> -> vector<16x1xf32>
    %112 = vector.broadcast %111 : vector<16x1xf32> to vector<16x16xf32>
    %113 = arith.mulf %108, %112 : vector<16x16xf32>
    %cst_38 = arith.constant dense<0.000000e+00> : vector<16x16xf32>
    %114 = tpu.matmul %113, %101, %cst_38 {dimension_numbers = #tpu.dot_dimension_numbers<[1], [0], [0], [1], [0, 0, 1, 1], [], []>} : vector<16x16xf32>, vector<16x16xf32>, vector<16x16xf32> -> vector<16x16xf32>
    %115 = vector.extract_strided_slice %61 {offsets = [32, 0], sizes = [16, 64], strides = [1, 1]} : vector<64x64xf32> to vector<16x64xf32>
    %cst_39 = arith.constant dense<0.000000e+00> : vector<16x64xf32>
    %116 = tpu.matmul %114, %115, %cst_39 {dimension_numbers = #tpu.dot_dimension_numbers<[1], [0], [0], [1], [0, 0, 1, 1], [], []>} : vector<16x16xf32>, vector<16x64xf32>, vector<16x64xf32> -> vector<16x64xf32>
    %117 = arith.addf %98, %116 : vector<16x64xf32>
    %118 = vector.extract_strided_slice %60 {offsets = [0, 48], sizes = [16, 16], strides = [1, 1]} : vector<16x192xf32> to vector<16x16xf32>
    %119 = vector.extract_strided_slice %60 {offsets = [0, 112], sizes = [16, 16], strides = [1, 1]} : vector<16x192xf32> to vector<16x16xf32>
    %120 = vector.extract_strided_slice %60 {offsets = [0, 176], sizes = [16, 16], strides = [1, 1]} : vector<16x192xf32> to vector<16x16xf32>
    %cst_40 = arith.constant dense<0.000000e+00> : vector<16x16xf32>
    %121 = tpu.matmul %118, %119, %cst_40 {dimension_numbers = #tpu.dot_dimension_numbers<[1], [1], [0], [0], [0, 0, 1, 0], [], []>} : vector<16x16xf32>, vector<16x16xf32>, vector<16x16xf32> -> vector<16x16xf32>
    %122 = arith.addf %121, %21 : vector<16x16xf32>
    %cst_41 = arith.constant dense<0xFF800000> : vector<16xf32>
    %123 = vector.multi_reduction <maximumf>, %122, %cst_41 [1] : vector<16x16xf32> to vector<16xf32>
    %124 = vector.shape_cast %123 : vector<16xf32> to vector<16x1xf32>
    %125 = vector.broadcast %124 : vector<16x1xf32> to vector<16x16xf32>
    %126 = arith.subf %122, %125 : vector<16x16xf32>
    %127 = math.exp %126 : vector<16x16xf32>
    %cst_42 = arith.constant dense<0.000000e+00> : vector<16xf32>
    %128 = vector.multi_reduction <add>, %127, %cst_42 [1] : vector<16x16xf32> to vector<16xf32>
    %129 = vector.shape_cast %128 : vector<16xf32> to vector<16x1xf32>
    %130 = tpu.reciprocal %129 {approx = true} : vector<16x1xf32> -> vector<16x1xf32>
    %131 = vector.broadcast %130 : vector<16x1xf32> to vector<16x16xf32>
    %132 = arith.mulf %127, %131 : vector<16x16xf32>
    %cst_43 = arith.constant dense<0.000000e+00> : vector<16x16xf32>
    %133 = tpu.matmul %132, %120, %cst_43 {dimension_numbers = #tpu.dot_dimension_numbers<[1], [0], [0], [1], [0, 0, 1, 1], [], []>} : vector<16x16xf32>, vector<16x16xf32>, vector<16x16xf32> -> vector<16x16xf32>
    %134 = vector.extract_strided_slice %61 {offsets = [48, 0], sizes = [16, 64], strides = [1, 1]} : vector<64x64xf32> to vector<16x64xf32>
    %cst_44 = arith.constant dense<0.000000e+00> : vector<16x64xf32>
    %135 = tpu.matmul %133, %134, %cst_44 {dimension_numbers = #tpu.dot_dimension_numbers<[1], [0], [0], [1], [0, 0, 1, 1], [], []>} : vector<16x16xf32>, vector<16x64xf32>, vector<16x64xf32> -> vector<16x64xf32>
    %136 = arith.addf %117, %135 : vector<16x64xf32>
    %c192 = arith.constant 192 : index
    %c0_45 = arith.constant 0 : index
    %137 = vector.load %arg2[%c192, %c0_45] : memref<840x256xf32, #tpu.memory_space<vmem>>, vector<1x64xf32>
    %138 = vector.broadcast %137 : vector<1x64xf32> to vector<16x64xf32>
    %139 = arith.addf %136, %138 : vector<16x64xf32>
    %140 = arith.addf %55, %139 : vector<16x64xf32>
    %141 = arith.mulf %140, %10 : vector<16x64xf32>
    %cst_46 = arith.constant dense<0.000000e+00> : vector<16xf32>
    %142 = vector.multi_reduction <add>, %141, %cst_46 [1] : vector<16x64xf32> to vector<16xf32>
    %143 = vector.shape_cast %142 : vector<16xf32> to vector<16x1xf32>
    %cst_47 = arith.constant 3.125000e-02 : f32
    %144 = vector.broadcast %cst_47 : f32 to vector<16x1xf32>
    %145 = arith.mulf %143, %144 : vector<16x1xf32>
    %146 = vector.broadcast %145 : vector<16x1xf32> to vector<16x64xf32>
    %147 = arith.subf %141, %146 : vector<16x64xf32>
    %148 = arith.mulf %147, %10 : vector<16x64xf32>
    %149 = arith.mulf %148, %148 : vector<16x64xf32>
    %cst_48 = arith.constant dense<0.000000e+00> : vector<16xf32>
    %150 = vector.multi_reduction <add>, %149, %cst_48 [1] : vector<16x64xf32> to vector<16xf32>
    %151 = vector.shape_cast %150 : vector<16xf32> to vector<16x1xf32>
    %cst_49 = arith.constant 3.125000e-02 : f32
    %152 = vector.broadcast %cst_49 : f32 to vector<16x1xf32>
    %153 = arith.mulf %151, %152 : vector<16x1xf32>
    %cst_50 = arith.constant 9.99999974E-6 : f32
    %154 = vector.broadcast %cst_50 : f32 to vector<16x1xf32>
    %155 = arith.addf %153, %154 : vector<16x1xf32>
    %156 = math.rsqrt %155 : vector<16x1xf32>
    %157 = vector.broadcast %156 : vector<16x1xf32> to vector<16x64xf32>
    %158 = arith.mulf %148, %157 : vector<16x64xf32>
    %c344 = arith.constant 344 : index
    %c0_51 = arith.constant 0 : index
    %159 = vector.load %arg2[%c344, %c0_51] : memref<840x256xf32, #tpu.memory_space<vmem>>, vector<1x64xf32>
    %160 = vector.broadcast %159 : vector<1x64xf32> to vector<16x64xf32>
    %161 = arith.mulf %158, %160 : vector<16x64xf32>
    %c352 = arith.constant 352 : index
    %c0_52 = arith.constant 0 : index
    %162 = vector.load %arg2[%c352, %c0_52] : memref<840x256xf32, #tpu.memory_space<vmem>>, vector<1x64xf32>
    %163 = vector.broadcast %162 : vector<1x64xf32> to vector<16x64xf32>
    %164 = arith.mulf %163, %10 : vector<16x64xf32>
    %165 = arith.addf %161, %164 : vector<16x64xf32>
    %c200 = arith.constant 200 : index
    %c0_53 = arith.constant 0 : index
    %166 = vector.load %arg2[%c200, %c0_53] : memref<840x256xf32, #tpu.memory_space<vmem>>, vector<64x64xf32>
    %cst_54 = arith.constant dense<0.000000e+00> : vector<16x64xf32>
    %167 = tpu.matmul %165, %166, %cst_54 {dimension_numbers = #tpu.dot_dimension_numbers<[1], [0], [0], [1], [0, 0, 1, 1], [], []>} : vector<16x64xf32>, vector<64x64xf32>, vector<16x64xf32> -> vector<16x64xf32>
    %c264 = arith.constant 264 : index
    %c0_55 = arith.constant 0 : index
    %168 = vector.load %arg2[%c264, %c0_55] : memref<840x256xf32, #tpu.memory_space<vmem>>, vector<1x64xf32>
    %169 = vector.broadcast %168 : vector<1x64xf32> to vector<16x64xf32>
    %170 = arith.addf %167, %169 : vector<16x64xf32>
    %cst_56 = arith.constant 0.000000e+00 : f32
    %171 = vector.broadcast %cst_56 : f32 to vector<16x64xf32>
    %172 = arith.maximumf %170, %171 : vector<16x64xf32>
    %c272 = arith.constant 272 : index
    %c0_57 = arith.constant 0 : index
    %173 = vector.load %arg2[%c272, %c0_57] : memref<840x256xf32, #tpu.memory_space<vmem>>, vector<64x64xf32>
    %cst_58 = arith.constant dense<0.000000e+00> : vector<16x64xf32>
    %174 = tpu.matmul %172, %173, %cst_58 {dimension_numbers = #tpu.dot_dimension_numbers<[1], [0], [0], [1], [0, 0, 1, 1], [], []>} : vector<16x64xf32>, vector<64x64xf32>, vector<16x64xf32> -> vector<16x64xf32>
    %c336 = arith.constant 336 : index
    %c0_59 = arith.constant 0 : index
    %175 = vector.load %arg2[%c336, %c0_59] : memref<840x256xf32, #tpu.memory_space<vmem>>, vector<1x64xf32>
    %176 = vector.broadcast %175 : vector<1x64xf32> to vector<16x64xf32>
    %177 = arith.addf %174, %176 : vector<16x64xf32>
    %178 = arith.addf %165, %177 : vector<16x64xf32>
    %179 = arith.mulf %178, %10 : vector<16x64xf32>
    %cst_60 = arith.constant dense<0.000000e+00> : vector<16xf32>
    %180 = vector.multi_reduction <add>, %179, %cst_60 [1] : vector<16x64xf32> to vector<16xf32>
    %181 = vector.shape_cast %180 : vector<16xf32> to vector<16x1xf32>
    %cst_61 = arith.constant 3.125000e-02 : f32
    %182 = vector.broadcast %cst_61 : f32 to vector<16x1xf32>
    %183 = arith.mulf %181, %182 : vector<16x1xf32>
    %184 = vector.broadcast %183 : vector<16x1xf32> to vector<16x64xf32>
    %185 = arith.subf %179, %184 : vector<16x64xf32>
    %186 = arith.mulf %185, %10 : vector<16x64xf32>
    %187 = arith.mulf %186, %186 : vector<16x64xf32>
    %cst_62 = arith.constant dense<0.000000e+00> : vector<16xf32>
    %188 = vector.multi_reduction <add>, %187, %cst_62 [1] : vector<16x64xf32> to vector<16xf32>
    %189 = vector.shape_cast %188 : vector<16xf32> to vector<16x1xf32>
    %cst_63 = arith.constant 3.125000e-02 : f32
    %190 = vector.broadcast %cst_63 : f32 to vector<16x1xf32>
    %191 = arith.mulf %189, %190 : vector<16x1xf32>
    %cst_64 = arith.constant 9.99999974E-6 : f32
    %192 = vector.broadcast %cst_64 : f32 to vector<16x1xf32>
    %193 = arith.addf %191, %192 : vector<16x1xf32>
    %194 = math.rsqrt %193 : vector<16x1xf32>
    %195 = vector.broadcast %194 : vector<16x1xf32> to vector<16x64xf32>
    %196 = arith.mulf %186, %195 : vector<16x64xf32>
    %c360 = arith.constant 360 : index
    %c0_65 = arith.constant 0 : index
    %197 = vector.load %arg2[%c360, %c0_65] : memref<840x256xf32, #tpu.memory_space<vmem>>, vector<1x64xf32>
    %198 = vector.broadcast %197 : vector<1x64xf32> to vector<16x64xf32>
    %199 = arith.mulf %196, %198 : vector<16x64xf32>
    %c368 = arith.constant 368 : index
    %c0_66 = arith.constant 0 : index
    %200 = vector.load %arg2[%c368, %c0_66] : memref<840x256xf32, #tpu.memory_space<vmem>>, vector<1x64xf32>
    %201 = vector.broadcast %200 : vector<1x64xf32> to vector<16x64xf32>
    %202 = arith.mulf %201, %10 : vector<16x64xf32>
    %203 = arith.addf %199, %202 : vector<16x64xf32>
    %c0_67 = arith.constant 0 : index
    %c0_68 = arith.constant 0 : index
    %c0_69 = arith.constant 0 : index
    %204 = vector.load %arg1[%c0_67, %c0_68, %c0_69] : memref<1x16x16xf32, #tpu.memory_space<vmem>>, vector<1x16x16xf32>
    %205 = vector.shape_cast %204 : vector<1x16x16xf32> to vector<16x16xf32>
    %cst_70 = arith.constant dense<0.000000e+00> : vector<16x64xf32>
    %206 = tpu.matmul %205, %203, %cst_70 {dimension_numbers = #tpu.dot_dimension_numbers<[1], [0], [0], [1], [0, 0, 1, 1], [], []>} : vector<16x16xf32>, vector<16x64xf32>, vector<16x64xf32> -> vector<16x64xf32>
    %207 = arith.addf %203, %206 : vector<16x64xf32>
    %208 = arith.mulf %207, %10 : vector<16x64xf32>
    %cst_71 = arith.constant dense<0.000000e+00> : vector<16xf32>
    %209 = vector.multi_reduction <add>, %208, %cst_71 [1] : vector<16x64xf32> to vector<16xf32>
    %210 = vector.shape_cast %209 : vector<16xf32> to vector<16x1xf32>
    %cst_72 = arith.constant 3.125000e-02 : f32
    %211 = vector.broadcast %cst_72 : f32 to vector<16x1xf32>
    %212 = arith.mulf %210, %211 : vector<16x1xf32>
    %213 = vector.broadcast %212 : vector<16x1xf32> to vector<16x64xf32>
    %214 = arith.subf %208, %213 : vector<16x64xf32>
    %215 = arith.mulf %214, %10 : vector<16x64xf32>
    %216 = arith.mulf %215, %215 : vector<16x64xf32>
    %cst_73 = arith.constant dense<0.000000e+00> : vector<16xf32>
    %217 = vector.multi_reduction <add>, %216, %cst_73 [1] : vector<16x64xf32> to vector<16xf32>
    %218 = vector.shape_cast %217 : vector<16xf32> to vector<16x1xf32>
    %cst_74 = arith.constant 3.125000e-02 : f32
    %219 = vector.broadcast %cst_74 : f32 to vector<16x1xf32>
    %220 = arith.mulf %218, %219 : vector<16x1xf32>
    %cst_75 = arith.constant 9.99999974E-6 : f32
    %221 = vector.broadcast %cst_75 : f32 to vector<16x1xf32>
    %222 = arith.addf %220, %221 : vector<16x1xf32>
    %223 = math.rsqrt %222 : vector<16x1xf32>
    %224 = vector.broadcast %223 : vector<16x1xf32> to vector<16x64xf32>
    %225 = arith.mulf %215, %224 : vector<16x64xf32>
    %c376 = arith.constant 376 : index
    %c0_76 = arith.constant 0 : index
    %226 = vector.load %arg2[%c376, %c0_76] : memref<840x256xf32, #tpu.memory_space<vmem>>, vector<1x64xf32>
    %227 = vector.broadcast %226 : vector<1x64xf32> to vector<16x64xf32>
    %228 = arith.mulf %225, %227 : vector<16x64xf32>
    %c384 = arith.constant 384 : index
    %c0_77 = arith.constant 0 : index
    %229 = vector.load %arg2[%c384, %c0_77] : memref<840x256xf32, #tpu.memory_space<vmem>>, vector<1x64xf32>
    %230 = vector.broadcast %229 : vector<1x64xf32> to vector<16x64xf32>
    %231 = arith.mulf %230, %10 : vector<16x64xf32>
    %232 = arith.addf %228, %231 : vector<16x64xf32>
    %233 = arith.addf %232, %55 : vector<16x64xf32>
    %c392 = arith.constant 392 : index
    %c0_78 = arith.constant 0 : index
    %234 = vector.load %arg2[%c392, %c0_78] : memref<840x256xf32, #tpu.memory_space<vmem>>, vector<32x64xf32>
    %cst_79 = arith.constant dense<0.000000e+00> : vector<16x64xf32>
    %235 = tpu.matmul %25, %234, %cst_79 {dimension_numbers = #tpu.dot_dimension_numbers<[1], [0], [0], [1], [0, 0, 1, 1], [], []>} : vector<16x32xf32>, vector<32x64xf32>, vector<16x64xf32> -> vector<16x64xf32>
    %c424 = arith.constant 424 : index
    %c0_80 = arith.constant 0 : index
    %236 = vector.load %arg2[%c424, %c0_80] : memref<840x256xf32, #tpu.memory_space<vmem>>, vector<1x64xf32>
    %237 = vector.broadcast %236 : vector<1x64xf32> to vector<16x64xf32>
    %238 = arith.addf %235, %237 : vector<16x64xf32>
    %239 = arith.mulf %238, %10 : vector<16x64xf32>
    %cst_81 = arith.constant dense<0.000000e+00> : vector<16xf32>
    %240 = vector.multi_reduction <add>, %239, %cst_81 [1] : vector<16x64xf32> to vector<16xf32>
    %241 = vector.shape_cast %240 : vector<16xf32> to vector<16x1xf32>
    %cst_82 = arith.constant 3.125000e-02 : f32
    %242 = vector.broadcast %cst_82 : f32 to vector<16x1xf32>
    %243 = arith.mulf %241, %242 : vector<16x1xf32>
    %244 = vector.broadcast %243 : vector<16x1xf32> to vector<16x64xf32>
    %245 = arith.subf %239, %244 : vector<16x64xf32>
    %246 = arith.mulf %245, %10 : vector<16x64xf32>
    %247 = arith.mulf %246, %246 : vector<16x64xf32>
    %cst_83 = arith.constant dense<0.000000e+00> : vector<16xf32>
    %248 = vector.multi_reduction <add>, %247, %cst_83 [1] : vector<16x64xf32> to vector<16xf32>
    %249 = vector.shape_cast %248 : vector<16xf32> to vector<16x1xf32>
    %cst_84 = arith.constant 3.125000e-02 : f32
    %250 = vector.broadcast %cst_84 : f32 to vector<16x1xf32>
    %251 = arith.mulf %249, %250 : vector<16x1xf32>
    %cst_85 = arith.constant 9.99999974E-6 : f32
    %252 = vector.broadcast %cst_85 : f32 to vector<16x1xf32>
    %253 = arith.addf %251, %252 : vector<16x1xf32>
    %254 = math.rsqrt %253 : vector<16x1xf32>
    %255 = vector.broadcast %254 : vector<16x1xf32> to vector<16x64xf32>
    %256 = arith.mulf %246, %255 : vector<16x64xf32>
    %c432 = arith.constant 432 : index
    %c0_86 = arith.constant 0 : index
    %257 = vector.load %arg2[%c432, %c0_86] : memref<840x256xf32, #tpu.memory_space<vmem>>, vector<1x64xf32>
    %258 = vector.broadcast %257 : vector<1x64xf32> to vector<16x64xf32>
    %259 = arith.mulf %256, %258 : vector<16x64xf32>
    %c440 = arith.constant 440 : index
    %c0_87 = arith.constant 0 : index
    %260 = vector.load %arg2[%c440, %c0_87] : memref<840x256xf32, #tpu.memory_space<vmem>>, vector<1x64xf32>
    %261 = vector.broadcast %260 : vector<1x64xf32> to vector<16x64xf32>
    %262 = arith.mulf %261, %10 : vector<16x64xf32>
    %263 = arith.addf %259, %262 : vector<16x64xf32>
    %cst_88 = arith.constant 2.000000e+00 : f32
    %264 = vector.broadcast %cst_88 : f32 to vector<16x64xf32>
    %265 = arith.mulf %264, %263 : vector<16x64xf32>
    %c448 = arith.constant 448 : index
    %c0_89 = arith.constant 0 : index
    %266 = vector.load %arg2[%c448, %c0_89] : memref<840x256xf32, #tpu.memory_space<vmem>>, vector<64x192xf32>
    %cst_90 = arith.constant dense<0.000000e+00> : vector<16x192xf32>
    %267 = tpu.matmul %263, %266, %cst_90 {dimension_numbers = #tpu.dot_dimension_numbers<[1], [0], [0], [1], [0, 0, 1, 1], [], []>} : vector<16x64xf32>, vector<64x192xf32>, vector<16x192xf32> -> vector<16x192xf32>
    %c512 = arith.constant 512 : index
    %c0_91 = arith.constant 0 : index
    %268 = vector.load %arg2[%c512, %c0_91] : memref<840x256xf32, #tpu.memory_space<vmem>>, vector<1x192xf32>
    %269 = vector.broadcast %268 : vector<1x192xf32> to vector<16x192xf32>
    %270 = arith.addf %267, %269 : vector<16x192xf32>
    %c520 = arith.constant 520 : index
    %c0_92 = arith.constant 0 : index
    %271 = vector.load %arg2[%c520, %c0_92] : memref<840x256xf32, #tpu.memory_space<vmem>>, vector<64x64xf32>
    %272 = vector.extract_strided_slice %270 {offsets = [0, 0], sizes = [16, 16], strides = [1, 1]} : vector<16x192xf32> to vector<16x16xf32>
    %273 = vector.extract_strided_slice %270 {offsets = [0, 64], sizes = [16, 16], strides = [1, 1]} : vector<16x192xf32> to vector<16x16xf32>
    %274 = vector.extract_strided_slice %270 {offsets = [0, 128], sizes = [16, 16], strides = [1, 1]} : vector<16x192xf32> to vector<16x16xf32>
    %cst_93 = arith.constant dense<0.000000e+00> : vector<16x16xf32>
    %275 = tpu.matmul %272, %273, %cst_93 {dimension_numbers = #tpu.dot_dimension_numbers<[1], [1], [0], [0], [0, 0, 1, 0], [], []>} : vector<16x16xf32>, vector<16x16xf32>, vector<16x16xf32> -> vector<16x16xf32>
    %276 = arith.addf %275, %24 : vector<16x16xf32>
    %cst_94 = arith.constant dense<0xFF800000> : vector<16xf32>
    %277 = vector.multi_reduction <maximumf>, %276, %cst_94 [1] : vector<16x16xf32> to vector<16xf32>
    %278 = vector.shape_cast %277 : vector<16xf32> to vector<16x1xf32>
    %279 = vector.broadcast %278 : vector<16x1xf32> to vector<16x16xf32>
    %280 = arith.subf %276, %279 : vector<16x16xf32>
    %281 = math.exp %280 : vector<16x16xf32>
    %cst_95 = arith.constant dense<0.000000e+00> : vector<16xf32>
    %282 = vector.multi_reduction <add>, %281, %cst_95 [1] : vector<16x16xf32> to vector<16xf32>
    %283 = vector.shape_cast %282 : vector<16xf32> to vector<16x1xf32>
    %284 = tpu.reciprocal %283 {approx = true} : vector<16x1xf32> -> vector<16x1xf32>
    %285 = vector.broadcast %284 : vector<16x1xf32> to vector<16x16xf32>
    %286 = arith.mulf %281, %285 : vector<16x16xf32>
    %cst_96 = arith.constant dense<0.000000e+00> : vector<16x16xf32>
    %287 = tpu.matmul %286, %274, %cst_96 {dimension_numbers = #tpu.dot_dimension_numbers<[1], [0], [0], [1], [0, 0, 1, 1], [], []>} : vector<16x16xf32>, vector<16x16xf32>, vector<16x16xf32> -> vector<16x16xf32>
    %288 = vector.extract_strided_slice %271 {offsets = [0, 0], sizes = [16, 64], strides = [1, 1]} : vector<64x64xf32> to vector<16x64xf32>
    %cst_97 = arith.constant dense<0.000000e+00> : vector<16x64xf32>
    %289 = tpu.matmul %287, %288, %cst_97 {dimension_numbers = #tpu.dot_dimension_numbers<[1], [0], [0], [1], [0, 0, 1, 1], [], []>} : vector<16x16xf32>, vector<16x64xf32>, vector<16x64xf32> -> vector<16x64xf32>
    %290 = vector.extract_strided_slice %270 {offsets = [0, 16], sizes = [16, 16], strides = [1, 1]} : vector<16x192xf32> to vector<16x16xf32>
    %291 = vector.extract_strided_slice %270 {offsets = [0, 80], sizes = [16, 16], strides = [1, 1]} : vector<16x192xf32> to vector<16x16xf32>
    %292 = vector.extract_strided_slice %270 {offsets = [0, 144], sizes = [16, 16], strides = [1, 1]} : vector<16x192xf32> to vector<16x16xf32>
    %cst_98 = arith.constant dense<0.000000e+00> : vector<16x16xf32>
    %293 = tpu.matmul %290, %291, %cst_98 {dimension_numbers = #tpu.dot_dimension_numbers<[1], [1], [0], [0], [0, 0, 1, 0], [], []>} : vector<16x16xf32>, vector<16x16xf32>, vector<16x16xf32> -> vector<16x16xf32>
    %294 = arith.addf %293, %24 : vector<16x16xf32>
    %cst_99 = arith.constant dense<0xFF800000> : vector<16xf32>
    %295 = vector.multi_reduction <maximumf>, %294, %cst_99 [1] : vector<16x16xf32> to vector<16xf32>
    %296 = vector.shape_cast %295 : vector<16xf32> to vector<16x1xf32>
    %297 = vector.broadcast %296 : vector<16x1xf32> to vector<16x16xf32>
    %298 = arith.subf %294, %297 : vector<16x16xf32>
    %299 = math.exp %298 : vector<16x16xf32>
    %cst_100 = arith.constant dense<0.000000e+00> : vector<16xf32>
    %300 = vector.multi_reduction <add>, %299, %cst_100 [1] : vector<16x16xf32> to vector<16xf32>
    %301 = vector.shape_cast %300 : vector<16xf32> to vector<16x1xf32>
    %302 = tpu.reciprocal %301 {approx = true} : vector<16x1xf32> -> vector<16x1xf32>
    %303 = vector.broadcast %302 : vector<16x1xf32> to vector<16x16xf32>
    %304 = arith.mulf %299, %303 : vector<16x16xf32>
    %cst_101 = arith.constant dense<0.000000e+00> : vector<16x16xf32>
    %305 = tpu.matmul %304, %292, %cst_101 {dimension_numbers = #tpu.dot_dimension_numbers<[1], [0], [0], [1], [0, 0, 1, 1], [], []>} : vector<16x16xf32>, vector<16x16xf32>, vector<16x16xf32> -> vector<16x16xf32>
    %306 = vector.extract_strided_slice %271 {offsets = [16, 0], sizes = [16, 64], strides = [1, 1]} : vector<64x64xf32> to vector<16x64xf32>
    %cst_102 = arith.constant dense<0.000000e+00> : vector<16x64xf32>
    %307 = tpu.matmul %305, %306, %cst_102 {dimension_numbers = #tpu.dot_dimension_numbers<[1], [0], [0], [1], [0, 0, 1, 1], [], []>} : vector<16x16xf32>, vector<16x64xf32>, vector<16x64xf32> -> vector<16x64xf32>
    %308 = arith.addf %289, %307 : vector<16x64xf32>
    %309 = vector.extract_strided_slice %270 {offsets = [0, 32], sizes = [16, 16], strides = [1, 1]} : vector<16x192xf32> to vector<16x16xf32>
    %310 = vector.extract_strided_slice %270 {offsets = [0, 96], sizes = [16, 16], strides = [1, 1]} : vector<16x192xf32> to vector<16x16xf32>
    %311 = vector.extract_strided_slice %270 {offsets = [0, 160], sizes = [16, 16], strides = [1, 1]} : vector<16x192xf32> to vector<16x16xf32>
    %cst_103 = arith.constant dense<0.000000e+00> : vector<16x16xf32>
    %312 = tpu.matmul %309, %310, %cst_103 {dimension_numbers = #tpu.dot_dimension_numbers<[1], [1], [0], [0], [0, 0, 1, 0], [], []>} : vector<16x16xf32>, vector<16x16xf32>, vector<16x16xf32> -> vector<16x16xf32>
    %313 = arith.addf %312, %24 : vector<16x16xf32>
    %cst_104 = arith.constant dense<0xFF800000> : vector<16xf32>
    %314 = vector.multi_reduction <maximumf>, %313, %cst_104 [1] : vector<16x16xf32> to vector<16xf32>
    %315 = vector.shape_cast %314 : vector<16xf32> to vector<16x1xf32>
    %316 = vector.broadcast %315 : vector<16x1xf32> to vector<16x16xf32>
    %317 = arith.subf %313, %316 : vector<16x16xf32>
    %318 = math.exp %317 : vector<16x16xf32>
    %cst_105 = arith.constant dense<0.000000e+00> : vector<16xf32>
    %319 = vector.multi_reduction <add>, %318, %cst_105 [1] : vector<16x16xf32> to vector<16xf32>
    %320 = vector.shape_cast %319 : vector<16xf32> to vector<16x1xf32>
    %321 = tpu.reciprocal %320 {approx = true} : vector<16x1xf32> -> vector<16x1xf32>
    %322 = vector.broadcast %321 : vector<16x1xf32> to vector<16x16xf32>
    %323 = arith.mulf %318, %322 : vector<16x16xf32>
    %cst_106 = arith.constant dense<0.000000e+00> : vector<16x16xf32>
    %324 = tpu.matmul %323, %311, %cst_106 {dimension_numbers = #tpu.dot_dimension_numbers<[1], [0], [0], [1], [0, 0, 1, 1], [], []>} : vector<16x16xf32>, vector<16x16xf32>, vector<16x16xf32> -> vector<16x16xf32>
    %325 = vector.extract_strided_slice %271 {offsets = [32, 0], sizes = [16, 64], strides = [1, 1]} : vector<64x64xf32> to vector<16x64xf32>
    %cst_107 = arith.constant dense<0.000000e+00> : vector<16x64xf32>
    %326 = tpu.matmul %324, %325, %cst_107 {dimension_numbers = #tpu.dot_dimension_numbers<[1], [0], [0], [1], [0, 0, 1, 1], [], []>} : vector<16x16xf32>, vector<16x64xf32>, vector<16x64xf32> -> vector<16x64xf32>
    %327 = arith.addf %308, %326 : vector<16x64xf32>
    %328 = vector.extract_strided_slice %270 {offsets = [0, 48], sizes = [16, 16], strides = [1, 1]} : vector<16x192xf32> to vector<16x16xf32>
    %329 = vector.extract_strided_slice %270 {offsets = [0, 112], sizes = [16, 16], strides = [1, 1]} : vector<16x192xf32> to vector<16x16xf32>
    %330 = vector.extract_strided_slice %270 {offsets = [0, 176], sizes = [16, 16], strides = [1, 1]} : vector<16x192xf32> to vector<16x16xf32>
    %cst_108 = arith.constant dense<0.000000e+00> : vector<16x16xf32>
    %331 = tpu.matmul %328, %329, %cst_108 {dimension_numbers = #tpu.dot_dimension_numbers<[1], [1], [0], [0], [0, 0, 1, 0], [], []>} : vector<16x16xf32>, vector<16x16xf32>, vector<16x16xf32> -> vector<16x16xf32>
    %332 = arith.addf %331, %24 : vector<16x16xf32>
    %cst_109 = arith.constant dense<0xFF800000> : vector<16xf32>
    %333 = vector.multi_reduction <maximumf>, %332, %cst_109 [1] : vector<16x16xf32> to vector<16xf32>
    %334 = vector.shape_cast %333 : vector<16xf32> to vector<16x1xf32>
    %335 = vector.broadcast %334 : vector<16x1xf32> to vector<16x16xf32>
    %336 = arith.subf %332, %335 : vector<16x16xf32>
    %337 = math.exp %336 : vector<16x16xf32>
    %cst_110 = arith.constant dense<0.000000e+00> : vector<16xf32>
    %338 = vector.multi_reduction <add>, %337, %cst_110 [1] : vector<16x16xf32> to vector<16xf32>
    %339 = vector.shape_cast %338 : vector<16xf32> to vector<16x1xf32>
    %340 = tpu.reciprocal %339 {approx = true} : vector<16x1xf32> -> vector<16x1xf32>
    %341 = vector.broadcast %340 : vector<16x1xf32> to vector<16x16xf32>
    %342 = arith.mulf %337, %341 : vector<16x16xf32>
    %cst_111 = arith.constant dense<0.000000e+00> : vector<16x16xf32>
    %343 = tpu.matmul %342, %330, %cst_111 {dimension_numbers = #tpu.dot_dimension_numbers<[1], [0], [0], [1], [0, 0, 1, 1], [], []>} : vector<16x16xf32>, vector<16x16xf32>, vector<16x16xf32> -> vector<16x16xf32>
    %344 = vector.extract_strided_slice %271 {offsets = [48, 0], sizes = [16, 64], strides = [1, 1]} : vector<64x64xf32> to vector<16x64xf32>
    %cst_112 = arith.constant dense<0.000000e+00> : vector<16x64xf32>
    %345 = tpu.matmul %343, %344, %cst_112 {dimension_numbers = #tpu.dot_dimension_numbers<[1], [0], [0], [1], [0, 0, 1, 1], [], []>} : vector<16x16xf32>, vector<16x64xf32>, vector<16x64xf32> -> vector<16x64xf32>
    %346 = arith.addf %327, %345 : vector<16x64xf32>
    %c584 = arith.constant 584 : index
    %c0_113 = arith.constant 0 : index
    %347 = vector.load %arg2[%c584, %c0_113] : memref<840x256xf32, #tpu.memory_space<vmem>>, vector<1x64xf32>
    %348 = vector.broadcast %347 : vector<1x64xf32> to vector<16x64xf32>
    %349 = arith.addf %346, %348 : vector<16x64xf32>
    %350 = arith.addf %265, %349 : vector<16x64xf32>
    %351 = arith.mulf %350, %10 : vector<16x64xf32>
    %c592 = arith.constant 592 : index
    %c0_114 = arith.constant 0 : index
    %352 = vector.load %arg2[%c592, %c0_114] : memref<840x256xf32, #tpu.memory_space<vmem>>, vector<64x1xf32>
    %cst_115 = arith.constant dense<0.000000e+00> : vector<16x1xf32>
    %353 = tpu.matmul %233, %352, %cst_115 {dimension_numbers = #tpu.dot_dimension_numbers<[1], [0], [0], [1], [0, 0, 1, 1], [], []>} : vector<16x64xf32>, vector<64x1xf32>, vector<16x1xf32> -> vector<16x1xf32>
    %354 = vector.extract_strided_slice %353 {offsets = [0, 0], sizes = [8, 1], strides = [1, 1]} : vector<16x1xf32> to vector<8x1xf32>
    %cst_116 = arith.constant dense<0xFF800000> : vector<1xf32>
    %355 = vector.multi_reduction <maximumf>, %354, %cst_116 [0] : vector<8x1xf32> to vector<1xf32>
    %356 = vector.shape_cast %355 : vector<1xf32> to vector<1x1xf32>
    %357 = vector.broadcast %356 : vector<1x1xf32> to vector<8x1xf32>
    %358 = arith.subf %354, %357 : vector<8x1xf32>
    %359 = math.exp %358 : vector<8x1xf32>
    %cst_117 = arith.constant dense<0.000000e+00> : vector<1xf32>
    %360 = vector.multi_reduction <add>, %359, %cst_117 [0] : vector<8x1xf32> to vector<1xf32>
    %361 = vector.shape_cast %360 : vector<1xf32> to vector<1x1xf32>
    %362 = vector.broadcast %361 : vector<1x1xf32> to vector<8x1xf32>
    %363 = arith.divf %359, %362 : vector<8x1xf32>
    %364 = vector.extract_strided_slice %353 {offsets = [8, 0], sizes = [8, 1], strides = [1, 1]} : vector<16x1xf32> to vector<8x1xf32>
    %cst_118 = arith.constant dense<0xFF800000> : vector<1xf32>
    %365 = vector.multi_reduction <maximumf>, %364, %cst_118 [0] : vector<8x1xf32> to vector<1xf32>
    %366 = vector.shape_cast %365 : vector<1xf32> to vector<1x1xf32>
    %367 = vector.broadcast %366 : vector<1x1xf32> to vector<8x1xf32>
    %368 = arith.subf %364, %367 : vector<8x1xf32>
    %369 = math.exp %368 : vector<8x1xf32>
    %cst_119 = arith.constant dense<0.000000e+00> : vector<1xf32>
    %370 = vector.multi_reduction <add>, %369, %cst_119 [0] : vector<8x1xf32> to vector<1xf32>
    %371 = vector.shape_cast %370 : vector<1xf32> to vector<1x1xf32>
    %372 = vector.broadcast %371 : vector<1x1xf32> to vector<8x1xf32>
    %373 = arith.divf %369, %372 : vector<8x1xf32>
    %374 = tpu.concatenate %363, %373 in 0 : vector<8x1xf32>, vector<8x1xf32> -> vector<16x1xf32>
    %375 = vector.broadcast %374 : vector<16x1xf32> to vector<16x64xf32>
    %376 = arith.mulf %375, %233 : vector<16x64xf32>
    %cst_120 = arith.constant 1.000000e+00 : f32
    %377 = vector.broadcast %cst_120 : f32 to vector<16x1xf32>
    %378 = arith.subf %377, %374 : vector<16x1xf32>
    %379 = vector.broadcast %378 : vector<16x1xf32> to vector<16x64xf32>
    %380 = arith.mulf %379, %351 : vector<16x64xf32>
    %381 = arith.addf %376, %380 : vector<16x64xf32>
    %382 = vector.extract_strided_slice %381 {offsets = [0, 0], sizes = [8, 64], strides = [1, 1]} : vector<16x64xf32> to vector<8x64xf32>
    %383 = vector.extract_strided_slice %381 {offsets = [8, 0], sizes = [8, 64], strides = [1, 1]} : vector<16x64xf32> to vector<8x64xf32>
    %384 = arith.addf %382, %383 : vector<8x64xf32>
    %c656 = arith.constant 656 : index
    %c0_121 = arith.constant 0 : index
    %385 = vector.load %arg2[%c656, %c0_121] : memref<840x256xf32, #tpu.memory_space<vmem>>, vector<64x64xf32>
    %cst_122 = arith.constant dense<0.000000e+00> : vector<8x64xf32>
    %386 = tpu.matmul %384, %385, %cst_122 {dimension_numbers = #tpu.dot_dimension_numbers<[1], [0], [0], [1], [0, 0, 1, 1], [], []>} : vector<8x64xf32>, vector<64x64xf32>, vector<8x64xf32> -> vector<8x64xf32>
    %c720 = arith.constant 720 : index
    %c0_123 = arith.constant 0 : index
    %387 = vector.load %arg2[%c720, %c0_123] : memref<840x256xf32, #tpu.memory_space<vmem>>, vector<1x64xf32>
    %388 = vector.broadcast %387 : vector<1x64xf32> to vector<8x64xf32>
    %389 = arith.addf %386, %388 : vector<8x64xf32>
    %cst_124 = arith.constant 0.000000e+00 : f32
    %390 = vector.broadcast %cst_124 : f32 to vector<8x64xf32>
    %391 = arith.maximumf %389, %390 : vector<8x64xf32>
    %c728 = arith.constant 728 : index
    %c0_125 = arith.constant 0 : index
    %392 = vector.load %arg2[%c728, %c0_125] : memref<840x256xf32, #tpu.memory_space<vmem>>, vector<64x32xf32>
    %cst_126 = arith.constant dense<0.000000e+00> : vector<8x32xf32>
    %393 = tpu.matmul %391, %392, %cst_126 {dimension_numbers = #tpu.dot_dimension_numbers<[1], [0], [0], [1], [0, 0, 1, 1], [], []>} : vector<8x64xf32>, vector<64x32xf32>, vector<8x32xf32> -> vector<8x32xf32>
    %c792 = arith.constant 792 : index
    %c0_127 = arith.constant 0 : index
    %394 = vector.load %arg2[%c792, %c0_127] : memref<840x256xf32, #tpu.memory_space<vmem>>, vector<1x32xf32>
    %395 = vector.broadcast %394 : vector<1x32xf32> to vector<8x32xf32>
    %396 = arith.addf %393, %395 : vector<8x32xf32>
    %cst_128 = arith.constant 0.000000e+00 : f32
    %397 = vector.broadcast %cst_128 : f32 to vector<8x32xf32>
    %398 = arith.maximumf %396, %397 : vector<8x32xf32>
    %c800 = arith.constant 800 : index
    %c0_129 = arith.constant 0 : index
    %399 = vector.load %arg2[%c800, %c0_129] : memref<840x256xf32, #tpu.memory_space<vmem>>, vector<32x2xf32>
    %cst_130 = arith.constant dense<0.000000e+00> : vector<8x2xf32>
    %400 = tpu.matmul %398, %399, %cst_130 {dimension_numbers = #tpu.dot_dimension_numbers<[1], [0], [0], [1], [0, 0, 1, 1], [], []>} : vector<8x32xf32>, vector<32x2xf32>, vector<8x2xf32> -> vector<8x2xf32>
    %c832 = arith.constant 832 : index
    %c0_131 = arith.constant 0 : index
    %401 = vector.load %arg2[%c832, %c0_131] : memref<840x256xf32, #tpu.memory_space<vmem>>, vector<1x2xf32>
    %402 = vector.broadcast %401 : vector<1x2xf32> to vector<8x2xf32>
    %403 = arith.addf %400, %402 : vector<8x2xf32>
    %cst_132 = arith.constant dense<0xFF800000> : vector<8xf32>
    %404 = vector.multi_reduction <maximumf>, %403, %cst_132 [1] : vector<8x2xf32> to vector<8xf32>
    %405 = vector.shape_cast %404 : vector<8xf32> to vector<8x1xf32>
    %406 = vector.broadcast %405 : vector<8x1xf32> to vector<8x2xf32>
    %407 = arith.subf %403, %406 : vector<8x2xf32>
    %408 = math.exp %407 : vector<8x2xf32>
    %cst_133 = arith.constant dense<0.000000e+00> : vector<8xf32>
    %409 = vector.multi_reduction <add>, %408, %cst_133 [1] : vector<8x2xf32> to vector<8xf32>
    %410 = vector.shape_cast %409 : vector<8xf32> to vector<8x1xf32>
    %411 = vector.broadcast %410 : vector<8x1xf32> to vector<8x2xf32>
    %412 = arith.divf %408, %411 : vector<8x2xf32>
    %413 = vector.extract_strided_slice %233 {offsets = [0, 0], sizes = [8, 32], strides = [1, 1]} : vector<16x64xf32> to vector<8x32xf32>
    %414 = vector.extract_strided_slice %233 {offsets = [8, 32], sizes = [8, 32], strides = [1, 1]} : vector<16x64xf32> to vector<8x32xf32>
    %415 = vector.extract_strided_slice %351 {offsets = [0, 0], sizes = [8, 32], strides = [1, 1]} : vector<16x64xf32> to vector<8x32xf32>
    %416 = vector.extract_strided_slice %351 {offsets = [8, 32], sizes = [8, 32], strides = [1, 1]} : vector<16x64xf32> to vector<8x32xf32>
    %cst_134 = arith.constant 0.000000e+00 : f32
    %417 = vector.broadcast %cst_134 : f32 to vector<8x62xf32>
    %418 = tpu.concatenate %413, %414, %415, %416, %384, %412, %417 in 1 : vector<8x32xf32>, vector<8x32xf32>, vector<8x32xf32>, vector<8x32xf32>, vector<8x64xf32>, vector<8x2xf32>, vector<8x62xf32> -> vector<8x256xf32>
    %c0_135 = arith.constant 0 : index
    %c0_136 = arith.constant 0 : index
    %419 = vector.load %arg3[%c0_135, %c0_136] : memref<8x256xf32, #tpu.memory_space<vmem>>, vector<8x256xf32>
    tpu.vector_store %arg3[%c0_135, %c0_136], %418 {strides = array<i32>} : memref<8x256xf32, #tpu.memory_space<vmem>>, vector<8x256xf32>,
    return
  }
}

</mosaic_0001>

<bundles_post_ra>
// kernel: my_mm_net_forward.1
= control target key start
LH: loop header
LB: loop body
LE: loop exit
PB: predicated region body
PF: predicated region fallthrough
CT: control target
= control target key end

     0   :  { %8 = vsyncpa [#allocation3], 0  ;;  %s4305_s12 = smov [#allocation2]   ;;  %s4854_s0 = inlined_call_operand.vmem [shape: f32[16,32], index: 0, kind: input, shape index: {}]   ;;  %s4855_s1 = inlined_call_operand.vmem [shape: f32[1,16,16], index: 1, kind: input, shape index: {}]   ;;  %s4856_s2 = inlined_call_operand.hbm [shape: f32[840,256], index: 2, kind: input, shape index: {}]   ;;  %s4857_s3 = inlined_call_operand.vmem [shape: f32[8,256], index: 3, kind: output, shape index: {}]  }
   0x1   :  { %s18_s13 = sshll.u32 %s4305_s12, 4  ;;  %s19_s13 = int_to_ptr.vmem [resolvable:$true] %s18_s13 }
   0x2   :  { %s4291_s14 = scalar_lea.vmem %s19_s13, 26880  ;;  %p4296_p1 = scmp.lt.s32.totalorder %s19_s13, %s19_s13 }
   0x3   :  { %p4292_p0 = scmp.ne.s32.totalorder %s19_s13, %s4291_s14  ;;  %p4297_p2 = scmp.lt.s32.totalorder %s4291_s14, %s4291_s14 }
   0x5   :  { %p4298_p3 = por %p4297_p2, %p4296_p1 }
   0x7   :  { %p4299_p4 = pnand %p4298_p3, %p4292_p0 }
   0x9   :  { %4302 = shalt.err (!%p4299_p4)
}
   0xa   :  { %s4306_s15 = smov 256   ;;  %s4307_s16 = smov 16  }
   0xb   :  { %24 = dma.hbm_to_vmem [thread:$0]  %s4856_s2, 26880, %s19_s13, [#allocation3], %s4306_s15, %s4306_s15, %s4307_s16  }
   0xc   :  { %4303 = dma.done.wait [#allocation3], 26880  }
   0xd   :  { %4304 = vsyncadd [#allocation3], 4294940416  ;;  %vm58_vm0 = vcmask 261120   ;;  %v56_v0 = vld [vmem:[#allocation2 + $0x30] sm:$0xff]  ;;  %v55_v1 = vld [vmem:[#allocation2 + $0x20] sm:$0xff]  ;;  %v4308_v6 = vmov 0.0   ;;  %v31_v7 = vlaneseq }
   0xe   :  { %3868 = vmatprep.subr.mxu0 %v56_v0  ;;  %v4346_v2 = vld [vmem:[%s4854_s0] sm:$0xff]  ;;  %v54_v3 = vld [vmem:[#allocation2 + $0x10] sm:$0xff]  ;;  %v4353_v5 = vld [vmem:[%s4854_s0 + $0x8] sm:$0xff]  ;;  %278 = vmatprep.mubr.f32.mxu1 %v4308_v6  ;;  %vm4309_vm2 = vmmov 1   ;;  %vm142_vm6 = vcmask 523264   ;;  %vm305_vm7 = vcmask 130048  }
   0xf   :  { %3869 = vmatpush3.msra.mxu0 %v56_v0  ;;  %3876 = vmatprep.mubr.msk.f32.mxu0 %vm58_vm0, %v4346_v2  ;;  %v53_v4 = vld [vmem:[#allocation2] sm:$0xff]  ;;  %v4359_v8 = vand.u32 127, %v31_v7  ;;  %v194_v32 = vld [vmem:[#allocation2 + $0xe8] sm:$0xff]  ;;  %v192_v34 = vld [vmem:[#allocation2 + $0xd8] sm:$0xff]  ;;  %s4310_s0 = smov 64   ;;  %s4311_s22 = smov 48  }
  0x10   :  { %3870 = vmatprep.subr.mxu0 %v55_v1  ;;  %v57_v10 = vld [vmem:[#allocation2 + $0x40] ss:$0 sm:$0xff]  ;;  %230 = vmatprep.subr.mxu1 %v194_v32  ;;  %v191_v35 = vld [vmem:[#allocation2 + $0xd0] sm:$0xff]  ;;  %v190_v36 = vld [vmem:[#allocation2 + $0xc8] sm:$0xff]  ;;  %s4312_s23 = smov 112   ;;  %s4314_s24 = smov 32  }
  0x11   :  { %3871 = vmatpush3.msra.mxu0 %v55_v1  ;;  %vm35_vm1 = vcmp.lt.s32.totalorder %v4359_v8, 32  ;;  %v193_v33 = vld [vmem:[#allocation2 + $0xe0] sm:$0xff]  ;;  %v188_v38 = vld [vmem:[#allocation2 + $0xb8] sm:$0xff]  ;;  %v187_v39 = vld [vmem:[#allocation2 + $0xb0] sm:$0xff]  ;;  %vm42_vm8 = vcmp.lt.s32.totalorder %v4359_v8, 8  ;;  %s4315_s25 = smov 96  }
  0x12   :  { %3872 = vmatprep.subr.mxu0 %v54_v3  ;;  %vm36_vm3 = vmxor %vm4309_vm2, %vm35_vm1  ;;  %231 = vmatpush1.msra.mxu1 %v193_v33  ;;  %v189_v37 = vld [vmem:[#allocation2 + $0xc0] sm:$0xff]  ;;  %v186_v40 = vld [vmem:[#allocation2 + $0xa8] sm:$0xff]  ;;  %s4316_s26 = smov 80   ;;  %vm3270_vm12 = vcmask 7168   ;;  %vm4318_vm13 = vmmov 0   ;;  %vm3582_vm14 = vcmask 15360  }
  0x13   :  { %3873 = vmatpush3.msra.mxu0 %v54_v3  ;;  %vm38_vm4 = vmxor %vm36_vm3, %vm4309_vm2  ;;  %232 = vmatprep.subr.mxu1 %v192_v34  ;;  %v185_v41 = vld [vmem:[#allocation2 + $0xa0] sm:$0xff]  ;;  %v184_v42 = vld [vmem:[#allocation2 + $0x98] sm:$0xff]  ;;  %v4391_v3 = vshrl.u32 %v31_v7, 7  ;;  %vm3608_vm15 = vcmask 785408  }
  0x14   :  { %3874 = vmatprep.subr.mxu0 %v53_v4  ;;  %vm39_vm5 = vmxor %vm35_vm1, %vm4309_vm2  ;;  %v4366_v12 = vsel %vm38_vm4, 1.0, %v4308_v6  ;;  %233 = vmatpush1.msra.mxu1 %v191_v35  ;;  %v183_v43 = vld [vmem:[#allocation2 + $0x90] sm:$0xff]  ;;  %v182_v44 = vld [vmem:[#allocation2 + $0x88] sm:$0xff]  ;;  %vm3611_vm1 = vcmask 539648  }
  0x15   :  { %3875 = vmatpush3.msra.mxu0 %v53_v4  ;;  %v4369_v15 = vsel %vm39_vm5, 1.0, %v4308_v6  ;;  %234 = vmatprep.subr.mxu1 %v190_v36  ;;  %v181_v45 = vld [vmem:[#allocation2 + $0x80] sm:$0xff]  ;;  %v180_v46 = vld [vmem:[#allocation2 + $0x78] sm:$0xff]  ;;  %v179_v47 = vld [vmem:[#allocation2 + $0x70] sm:$0xff]  ;;  %v200_v4 = vsub.s32 0, %v4391_v3 }
  0x16   :  { %3877 = vmatmul.mubr.msk.f32.vlgmr.msra.gmra.mxu0 %vm58_vm0, %v4353_v5  ;;  %235 = vmatpush1.msra.mxu1 %v189_v37  ;;  %v174_v54 = vld [vmem:[#allocation2 + $0x60] ss:$0 sm:$0xff]  ;;  %v171_v56 = vld [vmem:[#allocation2 + $0x50] ss:$0 sm:$0xff]  ;;  %vm43_vm9 = vmxor %vm4309_vm2, %vm42_vm8 }
  0x17   :  { %236 = vmatprep.subr.mxu1 %v188_v38  ;;  %v175_v58 = vmul.f32 %v174_v54, %v4366_v12  ;;  %v176_v63 = vmul.f32 %v174_v54, %v4369_v15  ;;  %vm4440_vm10 = vmxor %vm42_vm8, %vm4309_vm2 }
  0x18   :  { %237 = vmatpush1.msra.mxu1 %v187_v39  ;;  %vm4445_vm11 = vmxor %vm43_vm9, %vm4309_vm2 }
  0x19   :  { %238 = vmatprep.subr.mxu1 %v186_v40 }
  0x1a   :  { %239 = vmatpush1.msra.mxu1 %v185_v41 }
  0x1b   :  { %240 = vmatprep.subr.mxu1 %v184_v42 }
  0x1c   :  { %241 = vmatpush1.msra.mxu1 %v183_v43 }
  0x1d   :  { %242 = vmatprep.subr.mxu1 %v182_v44 }
  0x1e   :  { %243 = vmatpush1.msra.mxu1 %v181_v45 }
  0x1f   :  { %244 = vmatprep.subr.mxu1 %v180_v46 }
  0x20   :  { %245 = vmatpush1.msra.mxu1 %v179_v47 }
  0xd6   :  { %v3878_v9 = vpop.f32.mrf.mxu0 }
  0xd7   :  { %v137_v13 = vadd.f32 %v3878_v9, %v57_v10  ;;  %v196_v9 = vld [vmem:[#allocation2 + $0xf0] ss:$8 sm:$0x3] }
  0xd8   :  { %v131_v11 = vpop.f32.mrf.mxu0 }
  0xd9   :  { %v132_v14 = vadd.f32 %v131_v11, %v57_v10  ;;  %v141_v18 = vmul.f32 %v137_v13, %v4369_v15  ;;  %v201_v10 = vrot.slane %v196_v9, %v200_v4 }
  0xdb   :  { %v140_v16 = vmul.f32 %v132_v14, %v4366_v12  ;;  %v146_v19 = vsel %vm142_vm6, %v141_v18, 0.0 }
  0xdd   :  { %v143_v17 = vsel %vm142_vm6, %v140_v16, 0.0 }
  0xde   :  { %144 = vadd.xlane.f32.xlu0 %v143_v17 }
  0xe2   :  { %147 = vadd.xlane.f32.xlu0 %v146_v19 }
 0x167   :  { %v145_v20 = vpop.xlane.xlu0 %144 }
 0x168   :  { %v149_v21 = vmul.f32 0.03125, %v145_v20 }
 0x16a   :  { %v151_v22 = vsub.f32 %v140_v16, %v149_v21 }
 0x16b   :  { %v148_v23 = vpop.xlane.xlu0 %147 }
 0x16c   :  { %v150_v24 = vmul.f32 0.03125, %v148_v23  ;;  %v153_v25 = vmul.f32 %v151_v22, %v4366_v12 }
 0x16e   :  { %v152_v26 = vsub.f32 %v141_v18, %v150_v24  ;;  %v155_v27 = vmul.f32 %v153_v25, %v153_v25  ;;  %v204_v18 = vsub.s32 1, %v4391_v3 }
 0x170   :  { %v157_v28 = vsel %vm142_vm6, %v155_v27, 0.0  ;;  %v154_v29 = vmul.f32 %v152_v26, %v4369_v15  ;;  %v205_v22 = vrot.slane %v196_v9, %v204_v18 }
 0x171   :  { %158 = vadd.xlane.f32.xlu1 %v157_v28 }
 0x172   :  { %v156_v30 = vmul.f32 %v154_v29, %v154_v29 }
 0x174   :  { %v160_v31 = vsel %vm142_vm6, %v156_v30, 0.0  ;;  %v4313_v30 = vmov -1e+30  }
 0x175   :  { %161 = vadd.xlane.f32.xlu1 %v160_v31  ;;  %v4451_v31 = vsel %vm4440_vm10, 0.0, %v4313_v30  ;;  %v4455_v8 = vsel %vm4445_vm11, 0.0, %v4313_v30  ;;  %v293_v30 = vld [vmem:[#allocation2 + $0x120] sm:$0xff] }
 0x1fa   :  { %v159_v48 = vpop.xlane.xlu1 %158 }
 0x1fb   :  { %v163_v49 = vmul.f32 0.03125, %v159_v48 }
 0x1fd   :  { %v165_v50 = vadd.f32 1e-05, %v163_v49 }
 0x1fe   :  { %v162_v51 = vpop.xlane.xlu1 %161 }
 0x1ff   :  { %4187 = vrsqrt.f32 %v165_v50  ;;  %v164_v52 = vmul.f32 0.03125, %v162_v51 }
 0x201   :  { %v166_v53 = vadd.f32 1e-05, %v164_v52 }
 0x203   :  { %4189 = vrsqrt.f32 %v166_v53 }
 0x20c   :  { %v4188_v55 = vpop.eup %4187 }
 0x20d   :  { %v169_v57 = vmul.f32 %v4188_v55, %v153_v25 }
 0x20f   :  { %v172_v59 = vmul.f32 %v171_v56, %v169_v57 }
 0x210   :  { %v4190_v60 = vpop.eup %4189 }
 0x211   :  { %v4380_v61 = vadd.f32 %v175_v58, %v172_v59  ;;  %v170_v62 = vmul.f32 %v4190_v60, %v154_v29 }
 0x213   :  { %3622 = vmatmul.mubr.msk.f32.vlgmr.msra.gmra.mxu1 %vm142_vm6, %v4380_v61  ;;  %v173_v0 = vmul.f32 %v171_v56, %v170_v62 }
 0x214   :  { %284 = vmatprep.mubr.f32.mxu1 %v4308_v6 }
 0x215   :  { %v4386_v1 = vadd.f32 %v176_v63, %v173_v0 }
 0x217   :  { %3623 = vmatmul.mubr.msk.f32.gmra.mxu1 %vm142_vm6, %v4386_v1 }
 0x2d3   :  { %v280_v11 = vpop.f32.mrf.mxu1 }
 0x2d4   :  { %v4396_v13 = vadd.f32 %v280_v11, %v201_v10 }
 0x2d5   :  { %v282_v14 = vpop.f32.mrf.mxu1 }
 0x2d6   :  { %3883 = vmatprep.mubr.msk.f32.mxu0 %vm305_vm7, %v4396_v13  ;;  %301 = vrot.lane.b32.xlu1 %v4396_v13, %s4310_s0  ;;  %v4429_v27 = vadd.f32 %v282_v14, %v205_v22 }
 0x2d7   :  { %v286_v7 = vpop.f32.mrf.mxu1 }
 0x2d8   :  { %v4402_v16 = vadd.f32 %v286_v7, %v201_v10 }
 0x2d9   :  { %v288_v21 = vpop.f32.mrf.mxu1 }
 0x2da   :  { %498 = vrot.lane.b32.xlu1 %v4402_v16, %s4311_s22  ;;  %303 = vrot.lane.b32.xlu0 %v4402_v16, %s4310_s0  ;;  %v4422_v25 = vadd.f32 %v288_v21, %v205_v22 }
 0x2de   :  { %496 = vrot.lane.b32.xlu1 %v4396_v13, %s4311_s22  ;;  %492 = vrot.lane.b32.xlu0 %v4396_v13, %s4312_s23 }
 0x2e2   :  { %494 = vrot.lane.b32.xlu1 %v4402_v16, %s4312_s23 }
 0x348   :  { %v302_v17 = vpop.permute.xlu1 %301 }
 0x34c   :  { %v304_v19 = vpop.permute.xlu0 %303  ;;  %v499_v20 = vpop.permute.xlu1 %498 }
 0x34d   :  { %3879 = vmatprep.subr.msk.mxu0 %vm305_vm7, %v304_v19  ;;  %3893 = vmatprep.subr.msk.mxu1 %vm305_vm7, %v499_v20 }
 0x34e   :  { %3880 = vmatpush3.xpose.msk.msra.mxu0 %vm305_vm7, %v304_v19  ;;  %3894 = vmatpush3.xpose.msk.msra.mxu1 %vm305_vm7, %v499_v20 }
 0x34f   :  { %3881 = vmatprep.subr.msk.mxu0 %vm305_vm7, %v302_v17 }
 0x350   :  { %v493_v23 = vpop.permute.xlu0 %492  ;;  %v497_v24 = vpop.permute.xlu1 %496 }
 0x351   :  { %3895 = vmatprep.subr.msk.mxu1 %vm305_vm7, %v497_v24  ;;  %3897 = vmatprep.mubr.msk.f32.mxu1 %vm305_vm7, %v493_v23  ;;  %v294_v23 = vld [vmem:[#allocation2 + $0x130] sm:$0xff] }
 0x352   :  { %3882 = vmatpush3.xpose.msk.msra.mxu0 %vm305_vm7, %v302_v17  ;;  %3896 = vmatpush3.xpose.msk.msra.mxu1 %vm305_vm7, %v497_v24 }
 0x353   :  { %3886 = vmatprep.subr.mxu0 %v4422_v25 }
 0x354   :  { %v495_v26 = vpop.permute.xlu1 %494 }
 0x355   :  { %3884 = vmatmul.mubr.msk.f32.vlgmr.msra.gmra.mxu0 %vm305_vm7, %v4402_v16  ;;  %3898 = vmatmul.mubr.msk.f32.vlgmr.msra.gmra.mxu1 %vm305_vm7, %v495_v26 }
 0x356   :  { %3887 = vmatpush3.msra.mxu0 %v4422_v25 }
 0x357   :  { %3888 = vmatprep.subr.mxu0 %v4429_v27 }
 0x358   :  { %3889 = vmatpush3.msra.mxu0 %v4429_v27 }
 0x415   :  { %v3885_v32 = vpop.f32.mrf.mxu0  ;;  %v3899_v33 = vpop.f32.mrf.mxu1 }
 0x416   :  { %v386_v34 = vadd.f32 %v3885_v32, %v4451_v31  ;;  %v580_v41 = vadd.f32 %v3899_v33, %v4451_v31  ;;  %v292_v33 = vld [vmem:[#allocation2 + $0x110] sm:$0xff] }
 0x417   :  { %v380_v35 = vpop.f32.mrf.mxu0  ;;  %v574_v36 = vpop.f32.mrf.mxu1  ;;  %3914 = vmatprep.subr.mxu1 %v292_v33 }
 0x418   :  { %v381_v37 = vadd.f32 %v380_v35, %v4455_v8  ;;  %v392_v38 = vsel %vm305_vm7, %v386_v34, -inf  ;;  %v575_v39 = vadd.f32 %v574_v36, %v4455_v8  ;;  %v586_v43 = vsel %vm305_vm7, %v580_v41, -inf  ;;  %3915 = vmatpush3.msra.mxu1 %v292_v33 }
 0x419   :  { %393 = vmax.xlane.f32.xlu1 %v392_v38 }
 0x41a   :  { %v389_v40 = vsel %vm305_vm7, %v381_v37, -inf  ;;  %v583_v42 = vsel %vm305_vm7, %v575_v39, -inf }
 0x41b   :  { %390 = vmax.xlane.f32.xlu0 %v389_v40 }
 0x41f   :  { %584 = vmax.xlane.f32.xlu0 %v583_v42 }
 0x423   :  { %587 = vmax.xlane.f32.xlu0 %v586_v43 }
 0x4a2   :  { %v394_v44 = vpop.xlane.xlu1 %393 }
 0x4a3   :  { %v396_v45 = vsub.f32 %v386_v34, %v394_v44  ;;  %v291_v34 = vld [vmem:[#allocation2 + $0x100] sm:$0xff] }
 0x4a4   :  { %v391_v46 = vpop.xlane.xlu0 %390  ;;  %3916 = vmatprep.subr.mxu1 %v291_v34 }
 0x4a5   :  { %v399_v47 = vmul.f32 1.442695, %v396_v45  ;;  %v395_v48 = vsub.f32 %v381_v37, %v391_v46  ;;  %3917 = vmatpush3.msra.mxu1 %v291_v34 }
 0x4a7   :  { %4191 = vpow2.f32 %v399_v47  ;;  %v397_v49 = vmul.f32 1.442695, %v395_v48 }
 0x4a8   :  { %v585_v50 = vpop.xlane.xlu0 %584 }
 0x4a9   :  { %4193 = vpow2.f32 %v397_v49  ;;  %v589_v51 = vsub.f32 %v575_v39, %v585_v50 }
 0x4ab   :  { %v591_v52 = vmul.f32 1.442695, %v589_v51 }
 0x4ac   :  { %v588_v53 = vpop.xlane.xlu0 %587 }
 0x4ad   :  { %4195 = vpow2.f32 %v591_v52  ;;  %v590_v54 = vsub.f32 %v580_v41, %v588_v53 }
 0x4af   :  { %v593_v55 = vmul.f32 1.442695, %v590_v54 }
 0x4b1   :  { %4197 = vpow2.f32 %v593_v55 }
 0x4b4   :  { %v4192_v56 = vpop.eup %4191 }
 0x4b5   :  { %v404_v57 = vsel %vm305_vm7, %v4192_v56, 0.0 }
 0x4b6   :  { %v4194_v58 = vpop.eup %4193  ;;  %405 = vadd.xlane.f32.xlu1 %v404_v57 }
 0x4b7   :  { %v401_v59 = vsel %vm305_vm7, %v4194_v58, 0.0 }
 0x4b8   :  { %402 = vadd.xlane.f32.xlu0 %v401_v59 }
 0x4ba   :  { %v4196_v60 = vpop.eup %4195 }
 0x4bb   :  { %v595_v62 = vsel %vm305_vm7, %v4196_v60, 0.0 }
 0x4bc   :  { %596 = vadd.xlane.f32.xlu0 %v595_v62 }
 0x4be   :  { %v4198_v63 = vpop.eup %4197 }
 0x4bf   :  { %v598_v0 = vsel %vm305_vm7, %v4198_v63, 0.0 }
 0x4c0   :  { %599 = vadd.xlane.f32.xlu1 %v598_v0 }
 0x4d1   :  { %607 = vrot.lane.b32.xlu1 %v4429_v27, %s4312_s23 }
 0x4d2   :  { %609 = vrot.lane.b32.xlu0 %v4422_v25, %s4312_s23 }
 0x4d5   :  { %862 = vrot.lane.b32.xlu1 %v4402_v16, %s4314_s24 }
 0x4d6   :  { %856 = vrot.lane.b32.xlu0 %v4396_v13, %s4315_s25 }
 0x4d9   :  { %860 = vrot.lane.b32.xlu1 %v4396_v13, %s4314_s24 }
 0x4da   :  { %1145 = vrot.lane.b32.xlu0 %v4402_v16, %s4307_s16 }
 0x4dd   :  { %858 = vrot.lane.b32.xlu1 %v4402_v16, %s4315_s25 }
 0x4de   :  { %1139 = vrot.lane.b32.xlu0 %v4396_v13, %s4316_s26 }
 0x4e1   :  { %1143 = vrot.lane.b32.xlu1 %v4396_v13, %s4307_s16 }
 0x4e5   :  { %1141 = vrot.lane.b32.xlu1 %v4402_v16, %s4316_s26 }
 0x53f   :  { %v406_v9 = vpop.xlane.xlu1 %405 }
 0x540   :  { %4199 = vrcp.f32 %v406_v9 }
 0x541   :  { %v403_v10 = vpop.xlane.xlu0 %402 }
 0x542   :  { %4201 = vrcp.f32 %v403_v10 }
 0x545   :  { %v597_v11 = vpop.xlane.xlu0 %596 }
 0x546   :  { %4203 = vrcp.f32 %v597_v11 }
 0x549   :  { %v610_v14 = vpop.permute.xlu0 %609  ;;  %v600_v7 = vpop.xlane.xlu1 %599 }
 0x54a   :  { %4205 = vrcp.f32 %v600_v7  ;;  %3900 = vmatprep.subr.mxu0 %v610_v14 }
 0x54d   :  { %v4200_v17 = vpop.eup %4199  ;;  %v608_v16 = vpop.permute.xlu1 %607 }
 0x54e   :  { %v410_v21 = vmul.f32 %v4200_v17, %v4192_v56  ;;  %v857_v37 = vpop.permute.xlu0 %856 }
 0x54f   :  { %v4202_v19 = vpop.eup %4201 }
 0x550   :  { %v409_v20 = vmul.f32 %v4202_v19, %v4194_v58 }
 0x551   :  { %v863_v32 = vpop.permute.xlu1 %862 }
 0x552   :  { %3890 = vmatprep.mubr.msk.f32.mxu0 %vm305_vm7, %v409_v20  ;;  %v1146_v41 = vpop.permute.xlu0 %1145 }
 0x553   :  { %v4204_v13 = vpop.eup %4203  ;;  %3891 = vmatmul.mubr.msk.f32.vlgmr.msra.gmra.mxu0 %vm305_vm7, %v410_v21 }
 0x554   :  { %3901 = vmatpush3.msra.mxu0 %v610_v14  ;;  %v603_v22 = vmul.f32 %v4204_v13, %v4196_v60 }
 0x555   :  { %3902 = vmatprep.subr.mxu0 %v608_v16  ;;  %v861_v39 = vpop.permute.xlu1 %860 }
 0x556   :  { %3903 = vmatpush3.msra.mxu0 %v608_v16  ;;  %3904 = vmatprep.mubr.msk.f32.mxu0 %vm305_vm7, %v603_v22  ;;  %v1140_v43 = vpop.permute.xlu0 %1139 }
 0x557   :  { %v4206_v24 = vpop.eup %4205  ;;  %3907 = vmatprep.subr.mxu0 %v294_v23 }
 0x558   :  { %v604_v26 = vmul.f32 %v4206_v24, %v4198_v63 }
 0x559   :  { %v859_v42 = vpop.permute.xlu1 %858 }
 0x55a   :  { %3905 = vmatmul.mubr.msk.f32.vlgmr.msra.gmra.mxu0 %vm305_vm7, %v604_v26 }
 0x55b   :  { %3908 = vmatpush3.msra.mxu0 %v294_v23 }
 0x55c   :  { %3909 = vmatprep.subr.mxu0 %v293_v30 }
 0x55d   :  { %3910 = vmatpush3.msra.mxu0 %v293_v30  ;;  %v1144_v44 = vpop.permute.xlu1 %1143 }
 0x55e   :  { %3921 = vmatprep.subr.msk.mxu0 %vm305_vm7, %v863_v32 }
 0x561   :  { %v1142_v45 = vpop.permute.xlu1 %1141 }
 0x613   :  { %v3892_v35 = vpop.f32.mrf.mxu0 }
 0x615   :  { %v483_v36 = vpop.f32.mrf.mxu0 }
 0x616   :  { %3918 = vmatprep.mubr.msk.f32.mxu1 %vm305_vm7, %v483_v36  ;;  %v295_v36 = vld [vmem:[#allocation2 + $0x140] sm:$0xff] }
 0x617   :  { %3919 = vmatmul.mubr.msk.f32.vlgmr.msra.gmra.mxu1 %vm305_vm7, %v3892_v35 }
 0x61a   :  { %v3906_v38 = vpop.f32.mrf.mxu0 }
 0x61c   :  { %v685_v40 = vpop.f32.mrf.mxu0 }
 0x61d   :  { %3911 = vmatprep.mubr.msk.f32.mxu0 %vm305_vm7, %v685_v40 }
 0x61e   :  { %3912 = vmatmul.mubr.msk.f32.vlgmr.msra.gmra.mxu0 %vm305_vm7, %v3906_v38 }
 0x61f   :  { %3922 = vmatpush3.xpose.msk.msra.mxu0 %vm305_vm7, %v863_v32  ;;  %3925 = vmatprep.mubr.msk.f32.mxu0 %vm305_vm7, %v857_v37  ;;  %v296_v32 = vld [vmem:[#allocation2 + $0x150] sm:$0xff] }
 0x620   :  { %3923 = vmatprep.subr.msk.mxu0 %vm305_vm7, %v861_v39 }
 0x623   :  { %3924 = vmatpush3.xpose.msk.msra.mxu0 %vm305_vm7, %v861_v39 }
 0x624   :  { %3942 = vmatprep.subr.msk.mxu0 %vm305_vm7, %v1146_v41 }
 0x626   :  { %3926 = vmatmul.mubr.msk.f32.vlgmr.msra.gmra.mxu0 %vm305_vm7, %v859_v42 }
 0x627   :  { %3943 = vmatpush3.xpose.msk.msra.mxu0 %vm305_vm7, %v1146_v41  ;;  %3946 = vmatprep.mubr.msk.f32.mxu0 %vm305_vm7, %v1140_v43 }
 0x628   :  { %3944 = vmatprep.subr.msk.mxu0 %vm305_vm7, %v1144_v44 }
 0x62b   :  { %3945 = vmatpush3.xpose.msk.msra.mxu0 %vm305_vm7, %v1144_v44 }
 0x62e   :  { %3947 = vmatmul.mubr.msk.f32.vlgmr.msra.gmra.mxu0 %vm305_vm7, %v1142_v45 }
 0x6d7   :  { %v3920_v46 = vpop.f32.mrf.mxu1 }
 0x6d9   :  { %v847_v43 = vpop.f32.mrf.mxu1 }
 0x6de   :  { %v3913_v47 = vpop.f32.mrf.mxu0 }
 0x6df   :  { %v4509_v48 = vadd.f32 %v3920_v46, %v3913_v47 }
 0x6e0   :  { %v4511_v49 = vpop.f32.mrf.mxu0 }
 0x6e6   :  { %v3927_v50 = vpop.f32.mrf.mxu0 }
 0x6e7   :  { %v944_v51 = vadd.f32 %v3927_v50, %v4451_v31 }
 0x6e8   :  { %v938_v52 = vpop.f32.mrf.mxu0 }
 0x6e9   :  { %v939_v53 = vadd.f32 %v938_v52, %v4455_v8  ;;  %v950_v54 = vsel %vm305_vm7, %v944_v51, -inf }
 0x6ea   :  { %951 = vmax.xlane.f32.xlu1 %v950_v54  ;;  %v297_v54 = vld [vmem:[#allocation2 + $0x160] sm:$0xff] }
 0x6eb   :  { %v947_v55 = vsel %vm305_vm7, %v939_v53, -inf }
 0x6ec   :  { %948 = vmax.xlane.f32.xlu0 %v947_v55 }
 0x6ee   :  { %v3948_v56 = vpop.f32.mrf.mxu0 }
 0x6ef   :  { %v1227_v13 = vadd.f32 %v3948_v56, %v4451_v31  ;;  %v848_v56 = vadd.f32 %v847_v43, %v4511_v49  ;;  %v1563_v43 = vld [vmem:[#allocation2 + $0x280] sm:$0xff] }
 0x6f0   :  { %v1221_v57 = vpop.f32.mrf.mxu0 }
 0x6f1   :  { %v1222_v58 = vadd.f32 %v1221_v57, %v4455_v8  ;;  %v1233_v16 = vsel %vm305_vm7, %v1227_v13, -inf }
 0x6f3   :  { %v1230_v59 = vsel %vm305_vm7, %v1222_v58, -inf }
 0x6fb   :  { %969 = vrot.lane.b32.xlu1 %v4429_v27, %s4315_s25 }
 0x71f   :  { %1231 = vmax.xlane.f32.xlu1 %v1230_v59 }
 0x773   :  { %v952_v60 = vpop.xlane.xlu1 %951 }
 0x774   :  { %v954_v62 = vsub.f32 %v944_v51, %v952_v60 }
 0x775   :  { %v949_v63 = vpop.xlane.xlu0 %948 }
 0x776   :  { %v957_v0 = vmul.f32 1.442695, %v954_v62  ;;  %v953_v9 = vsub.f32 %v939_v53, %v949_v63  ;;  %v298_v53 = vld [vmem:[#allocation2 + $0x170] sm:$0xff] }
 0x777   :  { %v970_v8 = vpop.permute.xlu1 %969 }
 0x778   :  { %4207 = vpow2.f32 %v957_v0  ;;  %v955_v10 = vmul.f32 1.442695, %v953_v9  ;;  %v1422_v0 = vld [vmem:[#allocation2 + $0x180] ss:$0 sm:$0xff] }
 0x77a   :  { %4209 = vpow2.f32 %v955_v10 }
 0x785   :  { %v4208_v11 = vpop.eup %4207 }
 0x786   :  { %v962_v14 = vsel %vm305_vm7, %v4208_v11, 0.0 }
 0x787   :  { %v4210_v7 = vpop.eup %4209  ;;  %963 = vadd.xlane.f32.xlu0 %v962_v14 }
 0x788   :  { %v959_v17 = vsel %vm305_vm7, %v4210_v7, 0.0 }
 0x78b   :  { %960 = vadd.xlane.f32.xlu0 %v959_v17 }
 0x7a1   :  { %971 = vrot.lane.b32.xlu0 %v4422_v25, %s4315_s25 }
 0x7a8   :  { %v1232_v19 = vpop.xlane.xlu1 %1231 }
 0x7a9   :  { %v1236_v20 = vsub.f32 %v1222_v58, %v1232_v19 }
 0x7ab   :  { %v1238_v21 = vmul.f32 1.442695, %v1236_v20 }
 0x7ad   :  { %4211 = vpow2.f32 %v1238_v21 }
 0x7ba   :  { %v4212_v22 = vpop.eup %4211 }
 0x7bb   :  { %v1242_v23 = vsel %vm305_vm7, %v4212_v22, 0.0 }
 0x7c0   :  { %1234 = vmax.xlane.f32.xlu0 %v1233_v16 }
 0x7c4   :  { %1243 = vadd.xlane.f32.xlu0 %v1242_v23 }
 0x7da   :  { %1254 = vrot.lane.b32.xlu0 %v4422_v25, %s4316_s26 }
 0x810   :  { %v964_v24 = vpop.xlane.xlu0 %963 }
 0x811   :  { %4213 = vrcp.f32 %v964_v24 }
 0x814   :  { %v961_v26 = vpop.xlane.xlu0 %960 }
 0x815   :  { %4215 = vrcp.f32 %v961_v26 }
 0x818   :  { %v972_v30 = vpop.permute.xlu0 %971 }
 0x819   :  { %3928 = vmatprep.subr.mxu1 %v972_v30 }
 0x81a   :  { %3929 = vmatpush3.msra.mxu1 %v972_v30 }
 0x81b   :  { %3930 = vmatprep.subr.mxu1 %v970_v8 }
 0x81c   :  { %3931 = vmatpush3.msra.mxu1 %v970_v8 }
 0x81d   :  { %3935 = vmatprep.subr.mxu1 %v296_v32 }
 0x81e   :  { %v4214_v31 = vpop.eup %4213 }
 0x81f   :  { %v968_v35 = vmul.f32 %v4214_v31, %v4208_v11 }
 0x822   :  { %v4216_v33 = vpop.eup %4215 }
 0x823   :  { %v967_v34 = vmul.f32 %v4216_v33, %v4210_v7 }
 0x825   :  { %3932 = vmatprep.mubr.msk.f32.mxu1 %vm305_vm7, %v967_v34 }
 0x826   :  { %3933 = vmatmul.mubr.msk.f32.vlgmr.msra.gmra.mxu1 %vm305_vm7, %v968_v35  ;;  %v1472_v35 = vld [vmem:[#allocation2 + $0x200] sm:$0xff] }
 0x827   :  { %3936 = vmatpush3.msra.mxu1 %v296_v32  ;;  %3963 = vmatprep.subr.mxu0 %v1472_v35 }
 0x828   :  { %3937 = vmatprep.subr.mxu1 %v295_v36  ;;  %3964 = vmatpush3.msra.mxu0 %v1472_v35 }
 0x829   :  { %3938 = vmatpush3.msra.mxu1 %v295_v36  ;;  %v1471_v36 = vld [vmem:[#allocation2 + $0x1f0] sm:$0xff] }
 0x82a   :  { %3965 = vmatprep.subr.mxu0 %v1471_v36 }
 0x82b   :  { %3966 = vmatpush3.msra.mxu0 %v1471_v36 }
 0x849   :  { %v1235_v25 = vpop.xlane.xlu0 %1234 }
 0x84a   :  { %v1237_v37 = vsub.f32 %v1227_v13, %v1235_v25  ;;  %v1470_v25 = vld [vmem:[#allocation2 + $0x1e0] sm:$0xff] }
 0x84b   :  { %3967 = vmatprep.subr.mxu0 %v1470_v25 }
 0x84c   :  { %v1240_v38 = vmul.f32 1.442695, %v1237_v37  ;;  %v1469_v37 = vld [vmem:[#allocation2 + $0x1d0] sm:$0xff]  ;;  %3968 = vmatpush3.msra.mxu0 %v1470_v25 }
 0x84d   :  { %v1244_v39 = vpop.xlane.xlu0 %1243  ;;  %3969 = vmatprep.subr.mxu0 %v1469_v37 }
 0x84e   :  { %4217 = vpow2.f32 %v1240_v38  ;;  %v1468_v38 = vld [vmem:[#allocation2 + $0x1c0] sm:$0xff]  ;;  %3970 = vmatpush3.msra.mxu0 %v1469_v37 }
 0x84f   :  { %4219 = vrcp.f32 %v1244_v39  ;;  %v1467_v39 = vld [vmem:[#allocation2 + $0x1b0] sm:$0xff]  ;;  %3971 = vmatprep.subr.mxu0 %v1468_v38 }
 0x850   :  { %3972 = vmatpush3.msra.mxu0 %v1468_v38 }
 0x851   :  { %v1255_v40 = vpop.permute.xlu0 %1254  ;;  %3973 = vmatprep.subr.mxu0 %v1467_v39 }
 0x852   :  { %3949 = vmatprep.subr.mxu1 %v1255_v40  ;;  %3974 = vmatpush3.msra.mxu0 %v1467_v39 }
 0x85b   :  { %v4218_v41 = vpop.eup %4217 }
 0x85c   :  { %v1245_v42 = vsel %vm305_vm7, %v4218_v41, 0.0  ;;  %v4220_v44 = vpop.eup %4219 }
 0x85d   :  { %1246 = vadd.xlane.f32.xlu1 %v1245_v42  ;;  %v1250_v50 = vmul.f32 %v4220_v44, %v4212_v22  ;;  %v1564_v42 = vld [vmem:[#allocation2 + $0x290] sm:$0xff] }
 0x85e   :  { %v1562_v44 = vld [vmem:[#allocation2 + $0x270] sm:$0xff] }
 0x86e   :  { %1252 = vrot.lane.b32.xlu1 %v4429_v27, %s4316_s26 }
 0x8e6   :  { %v3934_v45 = vpop.f32.mrf.mxu1  ;;  %v1247_v46 = vpop.xlane.xlu1 %1246 }
 0x8e7   :  { %4221 = vrcp.f32 %v1247_v46  ;;  %v1560_v46 = vld [vmem:[#allocation2 + $0x250] sm:$0xff] }
 0x8e8   :  { %v1047_v47 = vpop.f32.mrf.mxu1 }
 0x8e9   :  { %3939 = vmatprep.mubr.msk.f32.mxu1 %vm305_vm7, %v1047_v47 }
 0x8ea   :  { %3940 = vmatmul.mubr.msk.f32.vlgmr.msra.gmra.mxu1 %vm305_vm7, %v3934_v45  ;;  %v1253_v51 = vpop.permute.xlu1 %1252  ;;  %v1561_v45 = vld [vmem:[#allocation2 + $0x260] sm:$0xff] }
 0x8eb   :  { %3950 = vmatpush3.msra.mxu1 %v1255_v40  ;;  %3953 = vmatprep.mubr.msk.f32.mxu1 %vm305_vm7, %v1250_v50  ;;  %v1466_v40 = vld [vmem:[#allocation2 + $0x1a0] sm:$0xff] }
 0x8ec   :  { %3951 = vmatprep.subr.mxu1 %v1253_v51  ;;  %3975 = vmatprep.subr.mxu0 %v1466_v40 }
 0x8ed   :  { %3952 = vmatpush3.msra.mxu1 %v1253_v51  ;;  %3976 = vmatpush3.msra.mxu0 %v1466_v40 }
 0x8ee   :  { %3956 = vmatprep.subr.mxu1 %v298_v53 }
 0x8f4   :  { %v4222_v52 = vpop.eup %4221 }
 0x8f5   :  { %v1251_v27 = vmul.f32 %v4222_v52, %v4218_v41  ;;  %v1465_v41 = vld [vmem:[#allocation2 + $0x190] sm:$0xff] }
 0x8f6   :  { %3977 = vmatprep.subr.mxu0 %v1465_v41 }
 0x8f7   :  { %3954 = vmatmul.mubr.msk.f32.vlgmr.msra.gmra.mxu1 %vm305_vm7, %v1251_v27  ;;  %3978 = vmatpush3.msra.mxu0 %v1465_v41 }
 0x8f8   :  { %3957 = vmatpush3.msra.mxu1 %v298_v53 }
 0x8f9   :  { %3958 = vmatprep.subr.mxu1 %v297_v54 }
 0x8fa   :  { %3959 = vmatpush3.msra.mxu1 %v297_v54 }
 0x8fb   :  { %3982 = vmatprep.subr.mxu1 %v1564_v42 }
 0x9aa   :  { %v3941_v55 = vpop.f32.mrf.mxu1 }
 0x9ab   :  { %v1138_v57 = vadd.f32 %v3941_v55, %v4509_v48 }
 0x9ac   :  { %v1128_v58 = vpop.f32.mrf.mxu1 }
 0x9ad   :  { %v1137_v59 = vadd.f32 %v1128_v58, %v848_v56  ;;  %v1457_v56 = vld [vmem:[#allocation2 + $0x2b0] ss:$0 sm:$0xff] }
 0x9b7   :  { %v3955_v60 = vpop.f32.mrf.mxu1 }
 0x9b9   :  { %v1330_v62 = vpop.f32.mrf.mxu1 }
 0x9ba   :  { %3960 = vmatprep.mubr.msk.f32.mxu1 %vm305_vm7, %v1330_v62 }
 0x9bb   :  { %3961 = vmatmul.mubr.msk.f32.vlgmr.msra.gmra.mxu1 %vm305_vm7, %v3955_v60 }
 0x9bc   :  { %3983 = vmatpush3.msra.mxu1 %v1564_v42 }
 0x9bd   :  { %3984 = vmatprep.subr.mxu1 %v1563_v43 }
 0x9be   :  { %3985 = vmatpush3.msra.mxu1 %v1563_v43 }
 0x9bf   :  { %3986 = vmatprep.subr.mxu1 %v1562_v44 }
 0x9c0   :  { %3987 = vmatpush3.msra.mxu1 %v1562_v44 }
 0x9c1   :  { %3988 = vmatprep.subr.mxu1 %v1561_v45 }
 0x9c2   :  { %3989 = vmatpush3.msra.mxu1 %v1561_v45 }
 0x9c3   :  { %3990 = vmatprep.subr.mxu1 %v1560_v46 }
 0x9c4   :  { %3991 = vmatpush3.msra.mxu1 %v1560_v46 }
 0xa7b   :  { %v3962_v63 = vpop.f32.mrf.mxu1 }
 0xa7c   :  { %v1421_v9 = vadd.f32 %v3962_v63, %v1138_v57  ;;  %v1460_v57 = vld [vmem:[#allocation2 + $0x2c0] ss:$0 sm:$0xff] }
 0xa7d   :  { %v1411_v10 = vpop.f32.mrf.mxu1  ;;  %v1461_v60 = vmul.f32 %v1460_v57, %v4366_v12  ;;  %v1462_v63 = vmul.f32 %v1460_v57, %v4369_v15 }
 0xa7e   :  { %v1424_v11 = vadd.f32 %v1422_v0, %v1421_v9  ;;  %v1420_v14 = vadd.f32 %v1411_v10, %v1137_v59 }
 0xa80   :  { %v1423_v7 = vadd.f32 %v1422_v0, %v1420_v14  ;;  %v1426_v17 = vadd.f32 %v1424_v11, %v4386_v1  ;;  %v1559_v11 = vld [vmem:[#allocation2 + $0x240] sm:$0xff]  ;;  %v1558_v14 = vld [vmem:[#allocation2 + $0x230] sm:$0xff] }
 0xa81   :  { %3992 = vmatprep.subr.mxu1 %v1559_v11 }
 0xa82   :  { %v1428_v49 = vmul.f32 %v1426_v17, %v4369_v15  ;;  %v1425_v48 = vadd.f32 %v1423_v7, %v4380_v61  ;;  %3993 = vmatpush3.msra.mxu1 %v1559_v11  ;;  %v1557_v7 = vld [vmem:[#allocation2 + $0x220] sm:$0xff] }
 0xa83   :  { %3994 = vmatprep.subr.mxu1 %v1558_v14  ;;  %v1815_v17 = vld [vmem:[#allocation2 + $0x340] sm:$0xff] }
 0xa84   :  { %v1432_v8 = vsel %vm142_vm6, %v1428_v49, 0.0  ;;  %v1427_v19 = vmul.f32 %v1425_v48, %v4366_v12  ;;  %3995 = vmatpush3.msra.mxu1 %v1558_v14 }
 0xa85   :  { %1433 = vadd.xlane.f32.xlu0 %v1432_v8  ;;  %3996 = vmatprep.subr.mxu1 %v1557_v7 }
 0xa86   :  { %v1429_v20 = vsel %vm142_vm6, %v1427_v19, 0.0  ;;  %3997 = vmatpush3.msra.mxu1 %v1557_v7 }
 0xa87   :  { %1430 = vadd.xlane.f32.xlu1 %v1429_v20  ;;  %4008 = vmatprep.subr.mxu1 %v1815_v17 }
 0xb0e   :  { %v1434_v21 = vpop.xlane.xlu0 %1433 }
 0xb0f   :  { %v1436_v13 = vmul.f32 0.03125, %v1434_v21 }
 0xb10   :  { %v1431_v16 = vpop.xlane.xlu1 %1430 }
 0xb11   :  { %v1438_v22 = vsub.f32 %v1428_v49, %v1436_v13  ;;  %v1435_v23 = vmul.f32 0.03125, %v1431_v16  ;;  %v1473_v49 = vld [vmem:[#allocation2 + $0x210] ss:$0 sm:$0xff] }
 0xb12   :  { %v1814_v16 = vld [vmem:[#allocation2 + $0x330] sm:$0xff] }
 0xb13   :  { %v1437_v24 = vsub.f32 %v1427_v19, %v1435_v23  ;;  %v1440_v26 = vmul.f32 %v1438_v22, %v4369_v15  ;;  %v1813_v22 = vld [vmem:[#allocation2 + $0x320] sm:$0xff]  ;;  %v1812_v23 = vld [vmem:[#allocation2 + $0x310] sm:$0xff] }
 0xb15   :  { %v1442_v30 = vmul.f32 %v1440_v26, %v1440_v26  ;;  %v1439_v32 = vmul.f32 %v1437_v24, %v4366_v12  ;;  %v1565_v24 = vld [vmem:[#allocation2 + $0x2a0] ss:$0 sm:$0xff] }
 0xb17   :  { %v1446_v31 = vsel %vm142_vm6, %v1442_v30, 0.0  ;;  %v1441_v33 = vmul.f32 %v1439_v32, %v1439_v32 }
 0xb18   :  { %1447 = vadd.xlane.f32.xlu1 %v1446_v31 }
 0xb19   :  { %v1443_v34 = vsel %vm142_vm6, %v1441_v33, 0.0 }
 0xb1a   :  { %1444 = vadd.xlane.f32.xlu0 %v1443_v34 }
 0xba1   :  { %v1448_v47 = vpop.xlane.xlu1 %1447 }
 0xba2   :  { %v1450_v50 = vmul.f32 0.03125, %v1448_v47 }
 0xba3   :  { %v1445_v51 = vpop.xlane.xlu0 %1444 }
 0xba4   :  { %v1452_v52 = vadd.f32 1e-05, %v1450_v50  ;;  %v1449_v27 = vmul.f32 0.03125, %v1445_v51 }
 0xba6   :  { %4223 = vrsqrt.f32 %v1452_v52  ;;  %v1451_v53 = vadd.f32 1e-05, %v1449_v27 }
 0xba8   :  { %4225 = vrsqrt.f32 %v1451_v53 }
 0xbb3   :  { %v4224_v54 = vpop.eup %4223 }
 0xbb4   :  { %v1456_v55 = vmul.f32 %v4224_v54, %v1440_v26 }
 0xbb5   :  { %v4226_v58 = vpop.eup %4225 }
 0xbb6   :  { %v1455_v59 = vmul.f32 %v4226_v58, %v1439_v32  ;;  %v1459_v62 = vmul.f32 %v1457_v56, %v1456_v55 }
 0xbb8   :  { %v1458_v0 = vmul.f32 %v1457_v56, %v1455_v59  ;;  %v1464_v10 = vadd.f32 %v1462_v63, %v1459_v62 }
 0xbba   :  { %v1463_v9 = vadd.f32 %v1461_v60, %v1458_v0 }
 0xbbc   :  { %3979 = vmatprep.mubr.msk.f32.mxu0 %vm142_vm6, %v1463_v9 }
 0xbbd   :  { %3980 = vmatmul.mubr.msk.f32.vlgmr.msra.gmra.mxu0 %vm142_vm6, %v1464_v10 }
 0xc7d   :  { %v3981_v48 = vpop.f32.mrf.mxu0 }
 0xc7e   :  { %v1552_v8 = vadd.f32 %v3981_v48, %v1473_v49 }
 0xc7f   :  { %v1546_v19 = vpop.f32.mrf.mxu0 }
 0xc80   :  { %v1547_v20 = vadd.f32 %v1546_v19, %v1473_v49  ;;  %v1556_v13 = vmax.f32 %v1552_v8, 0.0  ;;  %v1687_v49 = vld [vmem:[%s4855_s1] sm:$0xff] }
 0xc81   :  { %4005 = vmatprep.mubr.msk.f32.mxu0 %vm305_vm7, %v1687_v49 }
 0xc82   :  { %v1555_v21 = vmax.f32 %v1547_v20, 0.0 }
 0xc84   :  { %3998 = vmatprep.mubr.msk.f32.mxu1 %vm142_vm6, %v1555_v21 }
 0xc85   :  { %3999 = vmatmul.mubr.msk.f32.vlgmr.msra.gmra.mxu1 %vm142_vm6, %v1556_v13 }
 0xc86   :  { %4009 = vmatpush3.msra.mxu1 %v1815_v17  ;;  %4016 = vmatprep.mubr.msk.f32.mxu1 %vm58_vm0, %v4346_v2  ;;  %v1816_v2 = vld [vmem:[#allocation2 + $0x350] ss:$0 sm:$0xff] }
 0xc87   :  { %4010 = vmatprep.subr.mxu1 %v1814_v16 }
 0xc88   :  { %4011 = vmatpush3.msra.mxu1 %v1814_v16 }
 0xc89   :  { %4012 = vmatprep.subr.mxu1 %v1813_v22 }
 0xc8a   :  { %4013 = vmatpush3.msra.mxu1 %v1813_v22 }
 0xc8b   :  { %4014 = vmatprep.subr.mxu1 %v1812_v23 }
 0xc8c   :  { %4015 = vmatpush3.msra.mxu1 %v1812_v23 }
 0xc8d   :  { %4017 = vmatmul.mubr.msk.f32.vlgmr.msra.gmra.mxu1 %vm58_vm0, %v4353_v5 }
 0xd45   :  { %v4000_v26 = vpop.f32.mrf.mxu1 }
 0xd46   :  { %v1644_v30 = vadd.f32 %v4000_v26, %v1565_v24 }
 0xd47   :  { %v1638_v32 = vpop.f32.mrf.mxu1 }
 0xd48   :  { %v1648_v31 = vadd.f32 %v1644_v30, %v1464_v10  ;;  %v1639_v33 = vadd.f32 %v1638_v32, %v1565_v24  ;;  %v1682_v30 = vld [vmem:[#allocation2 + $0x2e0] ss:$0 sm:$0xff] }
 0xd4a   :  { %v1647_v34 = vadd.f32 %v1639_v33, %v1463_v9  ;;  %v1650_v35 = vmul.f32 %v1648_v31, %v4369_v15  ;;  %v1679_v31 = vld [vmem:[#allocation2 + $0x2d0] ss:$0 sm:$0xff] }
 0xd4c   :  { %v1654_v36 = vsel %vm142_vm6, %v1650_v35, 0.0  ;;  %v1649_v25 = vmul.f32 %v1647_v34, %v4366_v12 }
 0xd4d   :  { %v4018_v37 = vpop.f32.mrf.mxu1  ;;  %1655 = vadd.xlane.f32.xlu0 %v1654_v36 }
 0xd4e   :  { %v1889_v38 = vadd.f32 %v4018_v37, %v1816_v2  ;;  %v1651_v39 = vsel %vm142_vm6, %v1649_v25, 0.0  ;;  %v1683_v37 = vmul.f32 %v1682_v30, %v4366_v12 }
 0xd4f   :  { %v1883_v5 = vpop.f32.mrf.mxu1  ;;  %1652 = vadd.xlane.f32.xlu1 %v1651_v39 }
 0xd50   :  { %v1884_v40 = vadd.f32 %v1883_v5, %v1816_v2  ;;  %v1893_v41 = vmul.f32 %v1889_v38, %v4369_v15 }
 0xd52   :  { %v1897_v42 = vsel %vm142_vm6, %v1893_v41, 0.0  ;;  %v1892_v43 = vmul.f32 %v1884_v40, %v4366_v12  ;;  %v1688_v40 = vld [vmem:[%s4855_s1 + $0x8] sm:$0xff] }
 0xd53   :  { %1898 = vadd.xlane.f32.xlu1 %v1897_v42  ;;  %v1946_v42 = vld [vmem:[#allocation2 + $0x3f0] sm:$0xff] }
 0xd54   :  { %v1894_v44 = vsel %vm142_vm6, %v1892_v43, 0.0 }
 0xd55   :  { %1895 = vadd.xlane.f32.xlu0 %v1894_v44  ;;  %v1944_v44 = vld [vmem:[#allocation2 + $0x3e0] sm:$0xff] }
 0xdd6   :  { %v1656_v45 = vpop.xlane.xlu0 %1655 }
 0xdd7   :  { %v1658_v46 = vmul.f32 0.03125, %v1656_v45  ;;  %v1943_v45 = vld [vmem:[#allocation2 + $0x3d8] sm:$0xff] }
 0xdd8   :  { %v1653_v47 = vpop.xlane.xlu1 %1652 }
 0xdd9   :  { %v1660_v50 = vsub.f32 %v1650_v35, %v1658_v46  ;;  %v1657_v51 = vmul.f32 0.03125, %v1653_v47  ;;  %v1684_v35 = vmul.f32 %v1682_v30, %v4369_v15  ;;  %v1942_v46 = vld [vmem:[#allocation2 + $0x3d0] sm:$0xff] }
 0xddb   :  { %v1659_v52 = vsub.f32 %v1649_v25, %v1657_v51  ;;  %v1662_v27 = vmul.f32 %v1660_v50, %v4369_v15  ;;  %v1941_v50 = vld [vmem:[#allocation2 + $0x3c8] sm:$0xff]  ;;  %v1940_v51 = vld [vmem:[#allocation2 + $0x3c0] sm:$0xff] }
 0xddc   :  { %v1899_v53 = vpop.xlane.xlu1 %1898 }
 0xddd   :  { %v1901_v54 = vmul.f32 0.03125, %v1899_v53  ;;  %v1664_v55 = vmul.f32 %v1662_v27, %v1662_v27  ;;  %v1661_v56 = vmul.f32 %v1659_v52, %v4366_v12  ;;  %v1939_v52 = vld [vmem:[#allocation2 + $0x3b8] sm:$0xff]  ;;  %v1938_v53 = vld [vmem:[#allocation2 + $0x3b0] sm:$0xff] }
 0xdde   :  { %v1896_v57 = vpop.xlane.xlu0 %1895 }
 0xddf   :  { %v1903_v58 = vsub.f32 %v1893_v41, %v1901_v54  ;;  %v1900_v59 = vmul.f32 0.03125, %v1896_v57  ;;  %v1668_v60 = vsel %vm142_vm6, %v1664_v55, 0.0  ;;  %v1663_v62 = vmul.f32 %v1661_v56, %v1661_v56  ;;  %v1947_v41 = vld [vmem:[#allocation2 + $0x3f8] sm:$0xff]  ;;  %v1937_v55 = vld [vmem:[#allocation2 + $0x3a8] sm:$0xff]  ;;  %v1925_v57 = vld [vmem:[#allocation2 + $0x370] ss:$0 sm:$0xff] }
 0xde0   :  { %1669 = vadd.xlane.f32.xlu0 %v1668_v60  ;;  %v1934_v60 = vld [vmem:[#allocation2 + $0x390] sm:$0xff] }
 0xde1   :  { %v1902_v63 = vsub.f32 %v1892_v43, %v1900_v59  ;;  %v1665_v0 = vsel %vm142_vm6, %v1663_v62, 0.0  ;;  %v4576_v9 = vmul.f32 %v1903_v58, %v4369_v15  ;;  %v1945_v43 = vld [vmem:[#allocation2 + $0x3e8] sm:$0xff]  ;;  %v1936_v58 = vld [vmem:[#allocation2 + $0x3a0] sm:$0xff]  ;;  %v1935_v59 = vld [vmem:[#allocation2 + $0x398] sm:$0xff] }
 0xde2   :  { %1666 = vadd.xlane.f32.xlu1 %v1665_v0 }
 0xde3   :  { %v1907_v10 = vmul.f32 %v4576_v9, %v4576_v9  ;;  %v1904_v11 = vmul.f32 %v1902_v63, %v4366_v12  ;;  %v1926_v63 = vmul.f32 %v1925_v57, %v4366_v12 }
 0xde5   :  { %v1911_v14 = vsel %vm142_vm6, %v1907_v10, 0.0  ;;  %v1906_v7 = vmul.f32 %v1904_v11, %v1904_v11  ;;  %v1933_v10 = vld [vmem:[#allocation2 + $0x388] sm:$0xff] }
 0xde6   :  { %1912 = vadd.xlane.f32.xlu1 %v1911_v14 }
 0xde7   :  { %v1908_v17 = vsel %vm142_vm6, %v1906_v7, 0.0 }
 0xde8   :  { %1909 = vadd.xlane.f32.xlu0 %v1908_v17  ;;  %v1927_v17 = vmul.f32 %v1925_v57, %v4369_v15 }
 0xe69   :  { %v1670_v48 = vpop.xlane.xlu0 %1669 }
 0xe6a   :  { %v1672_v8 = vmul.f32 0.03125, %v1670_v48  ;;  %v1949_v48 = vld [vmem:[#allocation2 + $0x400] ss:$8 sm:$0x3] }
 0xe6b   :  { %v1667_v19 = vpop.xlane.xlu1 %1666 }
 0xe6c   :  { %v1674_v20 = vadd.f32 1e-05, %v1672_v8  ;;  %v1671_v21 = vmul.f32 0.03125, %v1667_v19  ;;  %v1954_v8 = vrot.slane %v1949_v48, %v200_v4 }
 0xe6e   :  { %4227 = vrsqrt.f32 %v1674_v20  ;;  %v1673_v13 = vadd.f32 1e-05, %v1671_v21  ;;  %v1958_v20 = vrot.slane %v1949_v48, %v204_v18 }
 0xe6f   :  { %v1913_v23 = vpop.xlane.xlu1 %1912 }
 0xe70   :  { %4229 = vrsqrt.f32 %v1673_v13  ;;  %v1915_v24 = vmul.f32 0.03125, %v1913_v23 }
 0xe71   :  { %v1910_v16 = vpop.xlane.xlu0 %1909 }
 0xe72   :  { %v1914_v22 = vmul.f32 0.03125, %v1910_v16  ;;  %v1917_v33 = vadd.f32 1e-05, %v1915_v24 }
 0xe74   :  { %v1916_v26 = vadd.f32 1e-05, %v1914_v22 }
 0xe76   :  { %4231 = vrsqrt.f32 %v1916_v26 }
 0xe77   :  { %4233 = vrsqrt.f32 %v1917_v33 }
 0xe7b   :  { %v4228_v32 = vpop.eup %4227 }
 0xe7c   :  { %v1678_v34 = vmul.f32 %v4228_v32, %v1662_v27 }
 0xe7d   :  { %v4230_v2 = vpop.eup %4229 }
 0xe7e   :  { %v1681_v36 = vmul.f32 %v1679_v31, %v1678_v34  ;;  %v1677_v25 = vmul.f32 %v4230_v2, %v1661_v56  ;;  %v1922_v56 = vld [vmem:[#allocation2 + $0x360] ss:$0 sm:$0xff]  ;;  %v4663_v34 = vsel %vm4440_vm10, -1e+30, %v4308_v6 }
 0xe80   :  { %v4589_v38 = vadd.f32 %v1684_v35, %v1681_v36  ;;  %v1680_v39 = vmul.f32 %v1679_v31, %v1677_v25  ;;  %v4668_v36 = vsel %vm4445_vm11, -1e+30, %v4308_v6 }
 0xe82   :  { %4001 = vmatprep.subr.mxu0 %v4589_v38  ;;  %v4592_v5 = vadd.f32 %v1683_v37, %v1680_v39 }
 0xe83   :  { %4002 = vmatpush3.msra.mxu0 %v4589_v38  ;;  %v4232_v47 = vpop.eup %4231 }
 0xe84   :  { %4003 = vmatprep.subr.mxu0 %v4592_v5  ;;  %v1920_v27 = vmul.f32 %v4232_v47, %v1904_v11  ;;  %v4234_v54 = vpop.eup %4233  ;;  %v1932_v11 = vld [vmem:[#allocation2 + $0x380] sm:$0xff] }
 0xe85   :  { %4004 = vmatpush3.msra.mxu0 %v4592_v5  ;;  %v1921_v0 = vmul.f32 %v4234_v54, %v4576_v9 }
 0xe86   :  { %4006 = vmatmul.mubr.msk.f32.vlgmr.msra.gmra.mxu0 %vm305_vm7, %v1688_v40  ;;  %1983 = vmatprep.subr.mxu0 %v1947_v41  ;;  %v1923_v62 = vmul.f32 %v1922_v56, %v1920_v27 }
 0xe87   :  { %1984 = vmatpush1.msra.mxu0 %v1946_v42  ;;  %2031 = vmatprep.mubr.f32.mxu0 %v4308_v6  ;;  %v1924_v7 = vmul.f32 %v1922_v56, %v1921_v0 }
 0xe88   :  { %1985 = vmatprep.subr.mxu0 %v1945_v43  ;;  %v4604_v14 = vadd.f32 %v1926_v63, %v1923_v62 }
 0xe89   :  { %1986 = vmatpush1.msra.mxu0 %v1944_v44  ;;  %v4610_v49 = vadd.f32 %v1927_v17, %v1924_v7 }
 0xe8a   :  { %1987 = vmatprep.subr.mxu0 %v1943_v45 }
 0xe8b   :  { %1988 = vmatpush1.msra.mxu0 %v1942_v46 }
 0xe8c   :  { %1989 = vmatprep.subr.mxu0 %v1941_v50 }
 0xe8d   :  { %1990 = vmatpush1.msra.mxu0 %v1940_v51 }
 0xe8e   :  { %1991 = vmatprep.subr.mxu0 %v1939_v52 }
 0xe8f   :  { %1992 = vmatpush1.msra.mxu0 %v1938_v53 }
 0xe90   :  { %1993 = vmatprep.subr.mxu0 %v1937_v55 }
 0xe91   :  { %1994 = vmatpush1.msra.mxu0 %v1936_v58 }
 0xe92   :  { %1995 = vmatprep.subr.mxu0 %v1935_v59 }
 0xe93   :  { %1996 = vmatpush1.msra.mxu0 %v1934_v60 }
 0xe94   :  { %1997 = vmatprep.subr.mxu0 %v1933_v10 }
 0xe95   :  { %1998 = vmatpush1.msra.mxu0 %v1932_v11 }
 0xe96   :  { %3664 = vmatmul.mubr.msk.f32.vlgmr.msra.gmra.mxu0 %vm142_vm6, %v4604_v14 }
 0xe97   :  { %2037 = vmatprep.mubr.f32.mxu0 %v4308_v6 }
 0xe9a   :  { %3665 = vmatmul.mubr.msk.f32.gmra.mxu0 %vm142_vm6, %v4610_v49 }
 0xf46   :  { %v4614_v9 = vpop.f32.mrf.mxu0 }
 0xf48   :  { %v4618_v19 = vpop.f32.mrf.mxu0 }
 0xf56   :  { %v2033_v21 = vpop.f32.mrf.mxu0 }
 0xf57   :  { %v4622_v13 = vadd.f32 %v2033_v21, %v1954_v8 }
 0xf58   :  { %v2035_v16 = vpop.f32.mrf.mxu0 }
 0xf59   :  { %v4624_v22 = vadd.f32 %v2035_v16, %v1958_v20  ;;  %2054 = vrot.lane.b32.xlu1 %v4622_v13, %s4310_s0  ;;  %4023 = vmatprep.mubr.msk.f32.mxu1 %vm305_vm7, %v4622_v13 }
 0xf5a   :  { %v2039_v23 = vpop.f32.mrf.mxu0 }
 0xf5b   :  { %v4630_v24 = vadd.f32 %v2039_v23, %v1954_v8 }
 0xf5c   :  { %v2041_v26 = vpop.f32.mrf.mxu0 }
 0xf5d   :  { %2250 = vrot.lane.b32.xlu1 %v4630_v24, %s4311_s22  ;;  %2056 = vrot.lane.b32.xlu0 %v4630_v24, %s4310_s0  ;;  %v4647_v31 = vadd.f32 %v2041_v26, %v1958_v20 }
 0xf61   :  { %2248 = vrot.lane.b32.xlu1 %v4622_v13, %s4311_s22  ;;  %2244 = vrot.lane.b32.xlu0 %v4622_v13, %s4312_s23 }
 0xf65   :  { %2246 = vrot.lane.b32.xlu1 %v4630_v24, %s4312_s23 }
 0xfcb   :  { %v2055_v3 = vpop.permute.xlu1 %2054 }
 0xfcf   :  { %v2057_v4 = vpop.permute.xlu0 %2056  ;;  %v2251_v18 = vpop.permute.xlu1 %2250 }
 0xfd0   :  { %4019 = vmatprep.subr.msk.mxu1 %vm305_vm7, %v2057_v4  ;;  %4033 = vmatprep.subr.msk.mxu0 %vm305_vm7, %v2251_v18 }
 0xfd1   :  { %4020 = vmatpush3.xpose.msk.msra.mxu1 %vm305_vm7, %v2057_v4  ;;  %4034 = vmatpush3.xpose.msk.msra.mxu0 %vm305_vm7, %v2251_v18  ;;  %v2047_v18 = vld [vmem:[#allocation2 + $0x440] sm:$0xff] }
 0xfd2   :  { %4021 = vmatprep.subr.msk.mxu1 %vm305_vm7, %v2055_v3 }
 0xfd3   :  { %v2245_v30 = vpop.permute.xlu0 %2244  ;;  %v2249_v32 = vpop.permute.xlu1 %2248 }
 0xfd4   :  { %4035 = vmatprep.subr.msk.mxu0 %vm305_vm7, %v2249_v32  ;;  %4037 = vmatprep.mubr.msk.f32.mxu0 %vm305_vm7, %v2245_v30 }
 0xfd5   :  { %4022 = vmatpush3.xpose.msk.msra.mxu1 %vm305_vm7, %v2055_v3  ;;  %4036 = vmatpush3.xpose.msk.msra.mxu0 %vm305_vm7, %v2249_v32  ;;  %v2046_v32 = vld [vmem:[#allocation2 + $0x430] sm:$0xff] }
 0xfd6   :  { %4026 = vmatprep.subr.mxu1 %v4647_v31 }
 0xfd7   :  { %v2247_v33 = vpop.permute.xlu1 %2246 }
 0xfd8   :  { %4024 = vmatmul.mubr.msk.f32.vlgmr.msra.gmra.mxu1 %vm305_vm7, %v4630_v24  ;;  %4038 = vmatmul.mubr.msk.f32.vlgmr.msra.gmra.mxu0 %vm305_vm7, %v2247_v33 }
 0xfd9   :  { %4027 = vmatpush3.msra.mxu1 %v4647_v31 }
 0xfda   :  { %4028 = vmatprep.subr.mxu1 %v4624_v22 }
 0xfdb   :  { %4029 = vmatpush3.msra.mxu1 %v4624_v22 }
0x1098   :  { %v4025_v35 = vpop.f32.mrf.mxu1  ;;  %v4039_v2 = vpop.f32.mrf.mxu0 }
0x1099   :  { %v2138_v25 = vadd.f32 %v4025_v35, %v4663_v34  ;;  %v2332_v43 = vadd.f32 %v4039_v2, %v4663_v34  ;;  %v2045_v35 = vld [vmem:[#allocation2 + $0x420] sm:$0xff]  ;;  %v2044_v2 = vld [vmem:[#allocation2 + $0x410] sm:$0xff] }
0x109a   :  { %v2132_v37 = vpop.f32.mrf.mxu1  ;;  %v2326_v39 = vpop.f32.mrf.mxu0  ;;  %4054 = vmatprep.subr.mxu0 %v2045_v35 }
0x109b   :  { %v2133_v40 = vadd.f32 %v2132_v37, %v4668_v36  ;;  %v2144_v41 = vsel %vm305_vm7, %v2138_v25, -inf  ;;  %v2327_v28 = vadd.f32 %v2326_v39, %v4668_v36  ;;  %v2338_v44 = vsel %vm305_vm7, %v2332_v43, -inf  ;;  %4055 = vmatpush3.msra.mxu0 %v2045_v35 }
0x109c   :  { %2145 = vmax.xlane.f32.xlu1 %v2144_v41  ;;  %4056 = vmatprep.subr.mxu0 %v2044_v2 }
0x109d   :  { %v2141_v42 = vsel %vm305_vm7, %v2133_v40, -inf  ;;  %v2335_v29 = vsel %vm305_vm7, %v2327_v28, -inf  ;;  %4057 = vmatpush3.msra.mxu0 %v2044_v2 }
0x109e   :  { %2142 = vmax.xlane.f32.xlu0 %v2141_v42 }
0x10a2   :  { %2336 = vmax.xlane.f32.xlu0 %v2335_v29 }
0x10a6   :  { %2339 = vmax.xlane.f32.xlu0 %v2338_v44 }
0x1125   :  { %v2146_v45 = vpop.xlane.xlu1 %2145 }
0x1126   :  { %v2148_v46 = vsub.f32 %v2138_v25, %v2146_v45 }
0x1127   :  { %v2143_v47 = vpop.xlane.xlu0 %2142 }
0x1128   :  { %v2151_v50 = vmul.f32 1.442695, %v2148_v46  ;;  %v2147_v51 = vsub.f32 %v2133_v40, %v2143_v47 }
0x112a   :  { %4235 = vpow2.f32 %v2151_v50  ;;  %v2149_v52 = vmul.f32 1.442695, %v2147_v51 }
0x112b   :  { %v2337_v27 = vpop.xlane.xlu0 %2336 }
0x112c   :  { %4237 = vpow2.f32 %v2149_v52  ;;  %v2341_v53 = vsub.f32 %v2327_v28, %v2337_v27 }
0x112e   :  { %v2343_v54 = vmul.f32 1.442695, %v2341_v53 }
0x112f   :  { %v2340_v55 = vpop.xlane.xlu0 %2339 }
0x1130   :  { %4239 = vpow2.f32 %v2343_v54  ;;  %v2342_v56 = vsub.f32 %v2332_v43, %v2340_v55 }
0x1132   :  { %v2345_v57 = vmul.f32 1.442695, %v2342_v56 }
0x1134   :  { %4241 = vpow2.f32 %v2345_v57 }
0x1137   :  { %v4236_v58 = vpop.eup %4235 }
0x1138   :  { %v2156_v59 = vsel %vm305_vm7, %v4236_v58, 0.0 }
0x1139   :  { %v4238_v60 = vpop.eup %4237  ;;  %2157 = vadd.xlane.f32.xlu1 %v2156_v59  ;;  %v1771_v59 = vadd.f32 %v4614_v9, %v4589_v38 }
0x113a   :  { %v2153_v62 = vsel %vm305_vm7, %v4238_v60, 0.0 }
0x113b   :  { %2154 = vadd.xlane.f32.xlu0 %v2153_v62 }
0x113d   :  { %v4240_v63 = vpop.eup %4239 }
0x113e   :  { %v2347_v0 = vsel %vm305_vm7, %v4240_v63, 0.0 }
0x113f   :  { %2348 = vadd.xlane.f32.xlu0 %v2347_v0 }
0x1141   :  { %v4242_v10 = vpop.eup %4241 }
0x1142   :  { %v2350_v11 = vsel %vm305_vm7, %v4242_v10, 0.0 }
0x1143   :  { %2351 = vadd.xlane.f32.xlu1 %v2350_v11 }
0x1154   :  { %2359 = vrot.lane.b32.xlu1 %v4624_v22, %s4312_s23 }
0x1155   :  { %2361 = vrot.lane.b32.xlu0 %v4647_v31, %s4312_s23 }
0x1158   :  { %2614 = vrot.lane.b32.xlu1 %v4630_v24, %s4314_s24 }
0x1159   :  { %2608 = vrot.lane.b32.xlu0 %v4622_v13, %s4315_s25 }
0x115c   :  { %2612 = vrot.lane.b32.xlu1 %v4622_v13, %s4314_s24 }
0x115d   :  { %2897 = vrot.lane.b32.xlu0 %v4630_v24, %s4307_s16 }
0x1160   :  { %2610 = vrot.lane.b32.xlu1 %v4630_v24, %s4315_s25 }
0x1161   :  { %2891 = vrot.lane.b32.xlu0 %v4622_v13, %s4316_s26 }
0x1164   :  { %2895 = vrot.lane.b32.xlu1 %v4622_v13, %s4307_s16 }
0x1168   :  { %2893 = vrot.lane.b32.xlu1 %v4630_v24, %s4316_s26 }
0x11c2   :  { %v2158_v7 = vpop.xlane.xlu1 %2157 }
0x11c3   :  { %4243 = vrcp.f32 %v2158_v7 }
0x11c4   :  { %v2155_v17 = vpop.xlane.xlu0 %2154 }
0x11c5   :  { %4245 = vrcp.f32 %v2155_v17 }
0x11c8   :  { %v2349_v48 = vpop.xlane.xlu0 %2348 }
0x11c9   :  { %4247 = vrcp.f32 %v2349_v48 }
0x11cc   :  { %v2362_v8 = vpop.permute.xlu0 %2361  ;;  %v2352_v20 = vpop.xlane.xlu1 %2351 }
0x11cd   :  { %4249 = vrcp.f32 %v2352_v20  ;;  %4040 = vmatprep.subr.mxu1 %v2362_v8 }
0x11d0   :  { %v4244_v21 = vpop.eup %4243  ;;  %v2360_v24 = vpop.permute.xlu1 %2359 }
0x11d1   :  { %v2162_v3 = vmul.f32 %v4244_v21, %v4236_v58  ;;  %v2609_v39 = vpop.permute.xlu0 %2608 }
0x11d2   :  { %v4246_v16 = vpop.eup %4245 }
0x11d3   :  { %v2161_v23 = vmul.f32 %v4246_v16, %v4238_v60 }
0x11d4   :  { %v2615_v33 = vpop.permute.xlu1 %2614 }
0x11d5   :  { %4030 = vmatprep.mubr.msk.f32.mxu1 %vm305_vm7, %v2161_v23  ;;  %v2898_v42 = vpop.permute.xlu0 %2897 }
0x11d6   :  { %v4248_v13 = vpop.eup %4247  ;;  %4031 = vmatmul.mubr.msk.f32.vlgmr.msra.gmra.mxu1 %vm305_vm7, %v2162_v3 }
0x11d7   :  { %4041 = vmatpush3.msra.mxu1 %v2362_v8  ;;  %v2355_v4 = vmul.f32 %v4248_v13, %v4240_v63  ;;  %v1773_v63 = vmul.f32 %v1771_v59, %v4369_v15  ;;  %v1770_v13 = vadd.f32 %v4618_v19, %v4592_v5  ;;  %v3188_v59 = vld [vmem:[#allocation2 + $0x510] sm:$0xff] }
0x11d8   :  { %4042 = vmatprep.subr.mxu1 %v2360_v24  ;;  %v2613_v41 = vpop.permute.xlu1 %2612 }
0x11d9   :  { %4043 = vmatpush3.msra.mxu1 %v2360_v24  ;;  %4044 = vmatprep.mubr.msk.f32.mxu1 %vm305_vm7, %v2355_v4  ;;  %v2892_v29 = vpop.permute.xlu0 %2891  ;;  %v1777_v0 = vsel %vm142_vm6, %v1773_v63, 0.0 }
0x11da   :  { %v4250_v26 = vpop.eup %4249  ;;  %4047 = vmatprep.subr.mxu1 %v2047_v18 }
0x11db   :  { %v2356_v30 = vmul.f32 %v4250_v26, %v4242_v10 }
0x11dc   :  { %v2611_v43 = vpop.permute.xlu1 %2610 }
0x11dd   :  { %4045 = vmatmul.mubr.msk.f32.vlgmr.msra.gmra.mxu1 %vm305_vm7, %v2356_v30 }
0x11de   :  { %4048 = vmatpush3.msra.mxu1 %v2047_v18  ;;  %v1772_v18 = vmul.f32 %v1770_v13, %v4366_v12 }
0x11df   :  { %4049 = vmatprep.subr.mxu1 %v2046_v32 }
0x11e0   :  { %4050 = vmatpush3.msra.mxu1 %v2046_v32  ;;  %v2896_v44 = vpop.permute.xlu1 %2895  ;;  %v1774_v26 = vsel %vm142_vm6, %v1772_v18, 0.0 }
0x11e1   :  { %4061 = vmatprep.subr.msk.mxu1 %vm305_vm7, %v2615_v33 }
0x11e4   :  { %v2894_v45 = vpop.permute.xlu1 %2893 }
0x1296   :  { %v4032_v25 = vpop.f32.mrf.mxu1 }
0x1298   :  { %v2235_v37 = vpop.f32.mrf.mxu1 }
0x1299   :  { %4058 = vmatprep.mubr.msk.f32.mxu0 %vm305_vm7, %v2235_v37 }
0x129a   :  { %4059 = vmatmul.mubr.msk.f32.vlgmr.msra.gmra.mxu0 %vm305_vm7, %v4032_v25 }
0x129d   :  { %v4046_v40 = vpop.f32.mrf.mxu1 }
0x129f   :  { %v2437_v28 = vpop.f32.mrf.mxu1 }
0x12a0   :  { %4051 = vmatprep.mubr.msk.f32.mxu1 %vm305_vm7, %v2437_v28 }
0x12a1   :  { %4052 = vmatmul.mubr.msk.f32.vlgmr.msra.gmra.mxu1 %vm305_vm7, %v4046_v40 }
0x12a2   :  { %4062 = vmatpush3.xpose.msk.msra.mxu1 %vm305_vm7, %v2615_v33  ;;  %4065 = vmatprep.mubr.msk.f32.mxu1 %vm305_vm7, %v2609_v39 }
0x12a3   :  { %4063 = vmatprep.subr.msk.mxu1 %vm305_vm7, %v2613_v41 }
0x12a6   :  { %4064 = vmatpush3.xpose.msk.msra.mxu1 %vm305_vm7, %v2613_v41 }
0x12a7   :  { %4082 = vmatprep.subr.msk.mxu1 %vm305_vm7, %v2898_v42 }
0x12a9   :  { %4066 = vmatmul.mubr.msk.f32.vlgmr.msra.gmra.mxu1 %vm305_vm7, %v2611_v43  ;;  %v2048_v43 = vld [vmem:[#allocation2 + $0x450] sm:$0xff] }
0x12aa   :  { %4083 = vmatpush3.xpose.msk.msra.mxu1 %vm305_vm7, %v2898_v42  ;;  %4086 = vmatprep.mubr.msk.f32.mxu1 %vm305_vm7, %v2892_v29 }
0x12ab   :  { %4084 = vmatprep.subr.msk.mxu1 %vm305_vm7, %v2896_v44 }
0x12ae   :  { %4085 = vmatpush3.xpose.msk.msra.mxu1 %vm305_vm7, %v2896_v44 }
0x12af   :  { %4103 = vmatprep.subr.mxu1 %v3188_v59 }
0x12b1   :  { %4087 = vmatmul.mubr.msk.f32.vlgmr.msra.gmra.mxu1 %vm305_vm7, %v2894_v45 }
0x12b2   :  { %4104 = vmatpush3.msra.mxu1 %v3188_v59 }
0x135a   :  { %v4060_v46 = vpop.f32.mrf.mxu0 }
0x1361   :  { %v4053_v47 = vpop.f32.mrf.mxu1 }
0x1362   :  { %v4722_v50 = vadd.f32 %v4060_v46, %v4053_v47 }
0x1363   :  { %v4724_v51 = vpop.f32.mrf.mxu1 }
0x1369   :  { %v4067_v52 = vpop.f32.mrf.mxu1 }
0x136a   :  { %v2696_v27 = vadd.f32 %v4067_v52, %v4663_v34 }
0x136b   :  { %v2690_v53 = vpop.f32.mrf.mxu1 }
0x136c   :  { %v2691_v54 = vadd.f32 %v2690_v53, %v4668_v36  ;;  %v2702_v55 = vsel %vm305_vm7, %v2696_v27, -inf }
0x136d   :  { %2703 = vmax.xlane.f32.xlu1 %v2702_v55 }
0x136e   :  { %v2699_v56 = vsel %vm305_vm7, %v2691_v54, -inf }
0x136f   :  { %2700 = vmax.xlane.f32.xlu0 %v2699_v56 }
0x1371   :  { %v4088_v57 = vpop.f32.mrf.mxu1 }
0x1372   :  { %v2979_v24 = vadd.f32 %v4088_v57, %v4663_v34 }
0x1373   :  { %v2973_v58 = vpop.f32.mrf.mxu1 }
0x1374   :  { %v2974_v60 = vadd.f32 %v2973_v58, %v4668_v36  ;;  %v2985_v4 = vsel %vm305_vm7, %v2979_v24, -inf }
0x1376   :  { %v2982_v62 = vsel %vm305_vm7, %v2974_v60, -inf }
0x137e   :  { %2721 = vrot.lane.b32.xlu1 %v4624_v22, %s4315_s25 }
0x13a2   :  { %2983 = vmax.xlane.f32.xlu1 %v2982_v62  ;;  %v3186_v62 = vld [vmem:[#allocation2 + $0x4f0] sm:$0xff] }
0x13a6   :  { %1778 = vadd.xlane.f32.xlu1 %v1777_v0  ;;  %v3184_v0 = vld [vmem:[#allocation2 + $0x4d0] sm:$0xff] }
0x13f6   :  { %v2704_v10 = vpop.xlane.xlu1 %2703 }
0x13f7   :  { %v2706_v11 = vsub.f32 %v2696_v27, %v2704_v10  ;;  %v3182_v10 = vld [vmem:[#allocation2 + $0x4b0] sm:$0xff] }
0x13f8   :  { %v2701_v7 = vpop.xlane.xlu0 %2700 }
0x13f9   :  { %v2709_v17 = vmul.f32 1.442695, %v2706_v11  ;;  %v2705_v48 = vsub.f32 %v2691_v54, %v2701_v7  ;;  %v3181_v11 = vld [vmem:[#allocation2 + $0x4a0] sm:$0xff]  ;;  %v2599_v7 = vpop.f32.mrf.mxu0 }
0x13fa   :  { %v2722_v21 = vpop.permute.xlu1 %2721 }
0x13fb   :  { %4251 = vpow2.f32 %v2709_v17  ;;  %v2707_v8 = vmul.f32 1.442695, %v2705_v48 }
0x13fd   :  { %4253 = vpow2.f32 %v2707_v8 }
0x1408   :  { %v4252_v20 = vpop.eup %4251 }
0x1409   :  { %v2714_v38 = vsel %vm305_vm7, %v4252_v20, 0.0 }
0x140a   :  { %v4254_v9 = vpop.eup %4253  ;;  %2715 = vadd.xlane.f32.xlu0 %v2714_v38 }
0x140b   :  { %v2711_v36 = vsel %vm305_vm7, %v4254_v9, 0.0 }
0x140e   :  { %2712 = vadd.xlane.f32.xlu0 %v2711_v36 }
0x1424   :  { %2723 = vrot.lane.b32.xlu0 %v4647_v31, %s4315_s25 }
0x142b   :  { %v2984_v16 = vpop.xlane.xlu1 %2983 }
0x142c   :  { %v2988_v23 = vsub.f32 %v2974_v60, %v2984_v16  ;;  %v3187_v60 = vld [vmem:[#allocation2 + $0x500] sm:$0xff] }
0x142d   :  { %4105 = vmatprep.subr.mxu1 %v3187_v60 }
0x142e   :  { %v2990_v3 = vmul.f32 1.442695, %v2988_v23  ;;  %4106 = vmatpush3.msra.mxu1 %v3187_v60 }
0x142f   :  { %v1779_v5 = vpop.xlane.xlu1 %1778  ;;  %4107 = vmatprep.subr.mxu1 %v3186_v62 }
0x1430   :  { %4255 = vpow2.f32 %v2990_v3  ;;  %v1781_v19 = vmul.f32 0.03125, %v1779_v5  ;;  %4108 = vmatpush3.msra.mxu1 %v3186_v62 }
0x1432   :  { %v1783_v34 = vsub.f32 %v1773_v63, %v1781_v19  ;;  %v3185_v63 = vld [vmem:[#allocation2 + $0x4e0] sm:$0xff] }
0x1433   :  { %4109 = vmatprep.subr.mxu1 %v3185_v63 }
0x1434   :  { %v4755_v33 = vmul.f32 %v1783_v34, %v4369_v15  ;;  %4110 = vmatpush3.msra.mxu1 %v3185_v63 }
0x1435   :  { %4111 = vmatprep.subr.mxu1 %v3184_v0 }
0x1436   :  { %v1787_v35 = vmul.f32 %v4755_v33, %v4755_v33  ;;  %4112 = vmatpush3.msra.mxu1 %v3184_v0 }
0x1438   :  { %v1791_v2 = vsel %vm142_vm6, %v1787_v35, 0.0 }
0x143d   :  { %v4748_v30 = vpop.eup %4255 }
0x143e   :  { %v2994_v32 = vsel %vm305_vm7, %v4748_v30, 0.0 }
0x1443   :  { %2986 = vmax.xlane.f32.xlu0 %v2985_v4 }
0x1447   :  { %1775 = vadd.xlane.f32.xlu0 %v1774_v26 }
0x144b   :  { %2995 = vadd.xlane.f32.xlu0 %v2994_v32  ;;  %v1805_v32 = vld [vmem:[#allocation2 + $0x300] ss:$0 sm:$0xff] }
0x144c   :  { %v1807_v34 = vmul.f32 %v1805_v32, %v4369_v15 }
0x1461   :  { %3006 = vrot.lane.b32.xlu0 %v4647_v31, %s4316_s26  ;;  %v2049_v31 = vld [vmem:[#allocation2 + $0x460] sm:$0xff] }
0x1480   :  { %1792 = vadd.xlane.f32.xlu0 %v1791_v2  ;;  %v1806_v2 = vmul.f32 %v1805_v32, %v4366_v12 }
0x1493   :  { %v2716_v25 = vpop.xlane.xlu0 %2715 }
0x1494   :  { %4257 = vrcp.f32 %v2716_v25 }
0x1497   :  { %v2713_v37 = vpop.xlane.xlu0 %2712 }
0x1498   :  { %4259 = vrcp.f32 %v2713_v37 }
0x149b   :  { %v2724_v39 = vpop.permute.xlu0 %2723 }
0x149c   :  { %4068 = vmatprep.subr.mxu0 %v2724_v39 }
0x149d   :  { %4069 = vmatpush3.msra.mxu0 %v2724_v39 }
0x149e   :  { %4070 = vmatprep.subr.mxu0 %v2722_v21 }
0x149f   :  { %4071 = vmatpush3.msra.mxu0 %v2722_v21 }
0x14a0   :  { %4075 = vmatprep.subr.mxu0 %v2049_v31 }
0x14a1   :  { %v4258_v40 = vpop.eup %4257 }
0x14a2   :  { %v2720_v42 = vmul.f32 %v4258_v40, %v4252_v20 }
0x14a5   :  { %v4260_v41 = vpop.eup %4259 }
0x14a6   :  { %v2719_v28 = vmul.f32 %v4260_v41, %v4254_v9  ;;  %v2050_v41 = vld [vmem:[#allocation2 + $0x470] sm:$0xff] }
0x14a8   :  { %4072 = vmatprep.mubr.msk.f32.mxu0 %vm305_vm7, %v2719_v28  ;;  %v4317_v28 = vmov 0  }
0x14a9   :  { %4073 = vmatmul.mubr.msk.f32.vlgmr.msra.gmra.mxu0 %vm305_vm7, %v2720_v42  ;;  %4186 = vset.pattern.permute.xlu1 %v4317_v28 }
0x14aa   :  { %4076 = vmatpush3.msra.mxu0 %v2049_v31  ;;  %4185 = vset.pattern.permute.xlu0 %v4317_v28  ;;  %v3338_v28 = vld [vmem:[#allocation2 + $0x520] sm:$0xff] }
0x14ab   :  { %4077 = vmatprep.subr.mxu0 %v2048_v43 }
0x14ac   :  { %4078 = vmatpush3.msra.mxu0 %v2048_v43 }
0x14cc   :  { %v2987_v29 = vpop.xlane.xlu0 %2986 }
0x14cd   :  { %v2989_v44 = vsub.f32 %v2979_v24, %v2987_v29 }
0x14cf   :  { %v2992_v45 = vmul.f32 1.442695, %v2989_v44 }
0x14d0   :  { %v1776_v46 = vpop.xlane.xlu0 %1775 }
0x14d1   :  { %4261 = vpow2.f32 %v2992_v45  ;;  %v1780_v54 = vmul.f32 0.03125, %v1776_v46 }
0x14d3   :  { %v1782_v55 = vsub.f32 %v1772_v18, %v1780_v54 }
0x14d4   :  { %v2996_v47 = vpop.xlane.xlu0 %2995 }
0x14d5   :  { %v1784_v56 = vmul.f32 %v1782_v55, %v4366_v12  ;;  %4263 = vrcp.f32 %v2996_v47 }
0x14d7   :  { %v1786_v57 = vmul.f32 %v1784_v56, %v1784_v56 }
0x14d8   :  { %v3007_v52 = vpop.permute.xlu0 %3006 }
0x14d9   :  { %4089 = vmatprep.subr.mxu0 %v3007_v52  ;;  %v1788_v58 = vsel %vm142_vm6, %v1786_v57, 0.0 }
0x14de   :  { %v4262_v27 = vpop.eup %4261 }
0x14df   :  { %v2997_v53 = vsel %vm305_vm7, %v4262_v27, 0.0 }
0x14e0   :  { %2998 = vadd.xlane.f32.xlu1 %v2997_v53 }
0x14e2   :  { %v4264_v17 = vpop.eup %4263 }
0x14e3   :  { %v3002_v38 = vmul.f32 %v4264_v17, %v4748_v30  ;;  %v1802_v30 = vld [vmem:[#allocation2 + $0x2f0] ss:$0 sm:$0xff] }
0x14f1   :  { %3004 = vrot.lane.b32.xlu1 %v4624_v22, %s4316_s26  ;;  %v3183_v22 = vld [vmem:[#allocation2 + $0x4c0] sm:$0xff] }
0x14f2   :  { %4113 = vmatprep.subr.mxu1 %v3183_v22 }
0x14f3   :  { %4114 = vmatpush3.msra.mxu1 %v3183_v22 }
0x14f4   :  { %4115 = vmatprep.subr.mxu1 %v3182_v10 }
0x14f5   :  { %4116 = vmatpush3.msra.mxu1 %v3182_v10 }
0x14f6   :  { %4117 = vmatprep.subr.mxu1 %v3181_v11 }
0x14f7   :  { %4118 = vmatpush3.msra.mxu1 %v3181_v11 }
0x14f8   :  { %4141 = vmatprep.subr.mxu1 %v4308_v6 }
0x1509   :  { %v1793_v16 = vpop.xlane.xlu0 %1792 }
0x150a   :  { %v1795_v23 = vmul.f32 0.03125, %v1793_v16 }
0x150c   :  { %v1797_v3 = vadd.f32 1e-05, %v1795_v23 }
0x1515   :  { %1789 = vadd.xlane.f32.xlu1 %v1788_v58  ;;  %v3345_v58 = vld [vmem:[#allocation2 + $0x590] sm:$0xff] }
0x1569   :  { %v4074_v48 = vpop.f32.mrf.mxu0  ;;  %v2999_v8 = vpop.xlane.xlu1 %2998 }
0x156a   :  { %4265 = vrcp.f32 %v2999_v8 }
0x156b   :  { %v2799_v20 = vpop.f32.mrf.mxu0  ;;  %4267 = vrsqrt.f32 %v1797_v3 }
0x156c   :  { %4079 = vmatprep.mubr.msk.f32.mxu0 %vm305_vm7, %v2799_v20 }
0x156d   :  { %4080 = vmatmul.mubr.msk.f32.vlgmr.msra.gmra.mxu0 %vm305_vm7, %v4074_v48  ;;  %v3005_v9 = vpop.permute.xlu1 %3004 }
0x156e   :  { %4090 = vmatpush3.msra.mxu0 %v3007_v52  ;;  %4093 = vmatprep.mubr.msk.f32.mxu0 %vm305_vm7, %v3002_v38 }
0x156f   :  { %4091 = vmatprep.subr.mxu0 %v3005_v9 }
0x1570   :  { %4092 = vmatpush3.msra.mxu0 %v3005_v9 }
0x1577   :  { %v4266_v36 = vpop.eup %4265 }
0x1578   :  { %v3003_v21 = vmul.f32 %v4266_v36, %v4262_v27  ;;  %v4268_v18 = vpop.eup %4267 }
0x1579   :  { %v1801_v26 = vmul.f32 %v4268_v18, %v4755_v33  ;;  %v2051_v33 = vld [vmem:[#allocation2 + $0x480] sm:$0xff] }
0x157a   :  { %4094 = vmatmul.mubr.msk.f32.vlgmr.msra.gmra.mxu0 %vm305_vm7, %v3003_v21  ;;  %4096 = vmatprep.subr.mxu0 %v2051_v33 }
0x157b   :  { %v1804_v19 = vmul.f32 %v1802_v30, %v1801_v26  ;;  %4097 = vmatpush3.msra.mxu0 %v2051_v33 }
0x157c   :  { %4098 = vmatprep.subr.mxu0 %v2050_v41 }
0x157d   :  { %v1809_v37 = vadd.f32 %v1807_v34, %v1804_v19  ;;  %4099 = vmatpush3.msra.mxu0 %v2050_v41  ;;  %v3343_v19 = vld [vmem:[#allocation2 + $0x570] sm:$0xff] }
0x157e   :  { %4122 = vmatprep.subr.mxu0 %v4308_v6  ;;  %v3339_v41 = vld [vmem:[#allocation2 + $0x530] sm:$0xff] }
0x157f   :  { %v4780_v40 = vadd.f32 %v1809_v37, %v4386_v1  ;;  %v2600_v1 = vadd.f32 %v2599_v7, %v4724_v51  ;;  %v3341_v37 = vld [vmem:[#allocation2 + $0x550] sm:$0xff] }
0x159e   :  { %v1790_v13 = vpop.xlane.xlu1 %1789 }
0x159f   :  { %v1794_v24 = vmul.f32 0.03125, %v1790_v13 }
0x15a1   :  { %v1796_v4 = vadd.f32 1e-05, %v1794_v24 }
0x15a3   :  { %4269 = vrsqrt.f32 %v1796_v4 }
0x15b0   :  { %v4270_v5 = vpop.eup %4269 }
0x15b1   :  { %v1800_v35 = vmul.f32 %v4270_v5, %v1784_v56 }
0x15b3   :  { %v1803_v25 = vmul.f32 %v1802_v30, %v1800_v35  ;;  %v3344_v30 = vld [vmem:[#allocation2 + $0x580] sm:$0xff] }
0x15b5   :  { %v1808_v39 = vadd.f32 %v1806_v2, %v1803_v25  ;;  %v3342_v2 = vld [vmem:[#allocation2 + $0x560] sm:$0xff] }
0x15b7   :  { %v4777_v31 = vadd.f32 %v1808_v39, %v4380_v61  ;;  %v3340_v39 = vld [vmem:[#allocation2 + $0x540] sm:$0xff] }
0x15b9   :  { %4119 = vmatprep.mubr.msk.f32.mxu1 %vm142_vm6, %v4777_v31 }
0x15ba   :  { %4120 = vmatmul.mubr.msk.f32.vlgmr.msra.gmra.mxu1 %vm142_vm6, %v4780_v40 }
0x15bb   :  { %4157 = vmatprep.mubr.msk.f32.mxu1 %vm4318_vm13, %v4308_v6 }
0x162d   :  { %v4081_v61 = vpop.f32.mrf.mxu0 }
0x162e   :  { %v4789_v42 = vadd.f32 %v4081_v61, %v4722_v50  ;;  %v3428_v61 = vld [vmem:[#allocation2 + $0x620] sm:$0xff] }
0x162f   :  { %v2880_v43 = vpop.f32.mrf.mxu0  ;;  %4142 = vmatpush3.msra.mxu1 %v3428_v61 }
0x1630   :  { %v4791_v29 = vadd.f32 %v2880_v43, %v2600_v1  ;;  %v3427_v1 = vld [vmem:[#allocation2 + $0x610] sm:$0xff]  ;;  %4143 = vmatprep.subr.mxu1 %v4308_v6  ;;  %v3426_v43 = vld [vmem:[#allocation2 + $0x600] sm:$0xff] }
0x1631   :  { %4144 = vmatpush3.msra.mxu1 %v3427_v1 }
0x1632   :  { %4145 = vmatprep.subr.mxu1 %v4308_v6 }
0x1633   :  { %4146 = vmatpush3.msra.mxu1 %v3426_v43 }
0x1634   :  { %4147 = vmatprep.subr.mxu1 %v4308_v6 }
0x163a   :  { %v4095_v44 = vpop.f32.mrf.mxu0 }
0x163c   :  { %v3082_v45 = vpop.f32.mrf.mxu0 }
0x163d   :  { %4100 = vmatprep.mubr.msk.f32.mxu0 %vm305_vm7, %v3082_v45  ;;  %v3424_v45 = vld [vmem:[#allocation2 + $0x5e0] sm:$0xff] }
0x163e   :  { %4101 = vmatmul.mubr.msk.f32.vlgmr.msra.gmra.mxu0 %vm305_vm7, %v4095_v44  ;;  %v3425_v44 = vld [vmem:[#allocation2 + $0x5f0] sm:$0xff] }
0x163f   :  { %4123 = vmatpush3.msra.mxu0 %v3345_v58  ;;  %4138 = vmatprep.mubr.msk.f32.mxu0 %vm4318_vm13, %v4308_v6 }
0x1640   :  { %4124 = vmatprep.subr.mxu0 %v4308_v6  ;;  %4148 = vmatpush3.msra.mxu1 %v3425_v44 }
0x1641   :  { %4125 = vmatpush3.msra.mxu0 %v3344_v30  ;;  %4149 = vmatprep.subr.mxu1 %v4308_v6 }
0x1642   :  { %4126 = vmatprep.subr.mxu0 %v4308_v6  ;;  %4150 = vmatpush3.msra.mxu1 %v3424_v45 }
0x1643   :  { %4127 = vmatpush3.msra.mxu0 %v3343_v19  ;;  %4151 = vmatprep.subr.mxu1 %v4308_v6 }
0x1644   :  { %4128 = vmatprep.subr.mxu0 %v4308_v6 }
0x1645   :  { %4129 = vmatpush3.msra.mxu0 %v3342_v2  ;;  %v3606_v2 = vsel %vm58_vm0, %v4777_v31, %v4780_v40 }
0x1646   :  { %4130 = vmatprep.subr.mxu0 %v4308_v6 }
0x1647   :  { %4131 = vmatpush3.msra.mxu0 %v3341_v37 }
0x1648   :  { %4132 = vmatprep.subr.mxu0 %v4308_v6 }
0x1649   :  { %4133 = vmatpush3.msra.mxu0 %v3340_v39 }
0x164a   :  { %4134 = vmatprep.subr.mxu0 %v4308_v6 }
0x164b   :  { %4135 = vmatpush3.msra.mxu0 %v3339_v41 }
0x164c   :  { %4136 = vmatprep.subr.mxu0 %v4308_v6 }
0x164d   :  { %4137 = vmatpush3.msra.mxu0 %v3338_v28 }
0x164e   :  { %4160 = vmatprep.subr.mxu0 %v4308_v6 }
0x167a   :  { %v4121_v46 = vpop.f32.mrf.mxu1 }
0x167b   :  { %v3290_v47 = vsel %vm3270_vm12, %v4121_v46, -inf }
0x167c   :  { %v3291_v52 = vrot.slane %v3290_v47, 4  ;;  %v3261_v27 = vpop.f32.mrf.mxu1 }
0x167d   :  { %v3271_v51 = vsel %vm3270_vm12, %v3261_v27, -inf }
0x167e   :  { %v3292_v53 = vmax.f32 %v3290_v47, %v3291_v52  ;;  %v3272_v50 = vrot.slane %v3271_v51, 4  ;;  %v3174_v47 = vld [vmem:[#allocation2 + $0x490] ss:$0 sm:$0xff] }
0x1680   :  { %v3293_v54 = vrot.slane %v3292_v53, 2  ;;  %v3273_v55 = vmax.f32 %v3271_v51, %v3272_v50  ;;  %v1931_v50 = vmul.f32 2.0, %v4610_v49 }
0x1682   :  { %v3294_v56 = vmax.f32 %v3292_v53, %v3293_v54  ;;  %v3274_v57 = vrot.slane %v3273_v55, 2 }
0x1684   :  { %v3295_v59 = vrot.slane %v3294_v56, 1  ;;  %v3275_v60 = vmax.f32 %v3273_v55, %v3274_v57  ;;  %v1930_v55 = vmul.f32 2.0, %v4604_v14  ;;  %v3421_v14 = vld [vmem:[#allocation2 + $0x5b0] sm:$0xff] }
0x1686   :  { %v3296_v62 = vmax.f32 %v3294_v56, %v3295_v59  ;;  %v3276_v63 = vrot.slane %v3275_v60, 1 }
0x1688   :  { %v3297_v0 = vsub.f32 %v4121_v46, %v3296_v62  ;;  %v3277_v22 = vmax.f32 %v3275_v60, %v3276_v63 }
0x168a   :  { %v3298_v10 = vmul.f32 1.442695, %v3297_v0  ;;  %v3278_v11 = vsub.f32 %v3261_v27, %v3277_v22 }
0x168c   :  { %4271 = vpow2.f32 %v3298_v10  ;;  %v3279_v7 = vmul.f32 1.442695, %v3278_v11 }
0x168e   :  { %4273 = vpow2.f32 %v3279_v7 }
0x1699   :  { %v4272_v17 = vpop.eup %4271 }
0x169a   :  { %v3300_v48 = vsel %vm3270_vm12, %v4272_v17, 0.0 }
0x169b   :  { %v4274_v8 = vpop.eup %4273  ;;  %v3301_v20 = vrot.slane %v3300_v48, 4 }
0x169c   :  { %v3281_v38 = vsel %vm3270_vm12, %v4274_v8, 0.0 }
0x169d   :  { %v3302_v9 = vadd.f32 %v3301_v20, %v3300_v48  ;;  %v3282_v36 = vrot.slane %v3281_v38, 4  ;;  %v3346_v48 = vld [vmem:[#allocation2 + $0x5a0] ss:$0 sm:$0xff] }
0x169f   :  { %v3303_v21 = vrot.slane %v3302_v9, 2  ;;  %v3283_v16 = vadd.f32 %v3282_v36, %v3281_v38  ;;  %v3506_v36 = vld [vmem:[#allocation2 + $0x660] sm:$0xff] }
0x16a1   :  { %v3304_v23 = vadd.f32 %v3303_v21, %v3302_v9  ;;  %v3284_v3 = vrot.slane %v3283_v16, 2  ;;  %v3505_v21 = vld [vmem:[#allocation2 + $0x650] sm:$0xff] }
0x16a3   :  { %v3305_v13 = vrot.slane %v3304_v23, 1  ;;  %v3285_v24 = vadd.f32 %v3284_v3, %v3283_v16  ;;  %v3504_v16 = vld [vmem:[#allocation2 + $0x640] sm:$0xff] }
0x16a5   :  { %v3306_v4 = vadd.f32 %v3305_v13, %v3304_v23  ;;  %v3286_v18 = vrot.slane %v3285_v24, 1  ;;  %v3429_v23 = vld [vmem:[#allocation2 + $0x630] ss:$0 sm:$0xff] }
0x16a7   :  { %4275 = vrcp.f32 %v3306_v4  ;;  %v3287_v26 = vadd.f32 %v3286_v18, %v3285_v24  ;;  %v3508_v18 = vld [vmem:[#allocation2 + $0x680] ss:$0 sm:$0xff] }
0x16a9   :  { %4277 = vrcp.f32 %v3287_v26 }
0x16b4   :  { %v4276_v32 = vpop.eup %4275 }
0x16b5   :  { %v3308_v5 = vmul.f32 %v4276_v32, %v4272_v17  ;;  %v3507_v17 = vld [vmem:[#allocation2 + $0x670] sm:$0xff] }
0x16b6   :  { %v4278_v34 = vpop.eup %4277 }
0x16b7   :  { %3316 = vperm.xlu1 %4186, %v3308_v5   ;;  %v3289_v35 = vmul.f32 %v4278_v34, %v4274_v8  ;;  %v3322_v33 = vsub.f32 1.0, %v3308_v5 }
0x16b9   :  { %3311 = vperm.xlu0 %4185, %v3289_v35   ;;  %v3321_v25 = vsub.f32 1.0, %v3289_v35 }
0x16bb   :  { %3325 = vperm.xlu1 %4186, %v3321_v25  }
0x16bf   :  { %3330 = vperm.xlu1 %4186, %v3322_v33  }
0x16fe   :  { %v4102_v46 = vpop.f32.mrf.mxu0 }
0x16ff   :  { %v3173_v52 = vadd.f32 %v4102_v46, %v4789_v42 }
0x1700   :  { %v3163_v27 = vpop.f32.mrf.mxu0 }
0x1701   :  { %v3176_v51 = vadd.f32 %v3174_v47, %v3173_v52  ;;  %v3172_v53 = vadd.f32 %v3163_v27, %v4791_v29 }
0x1703   :  { %v3175_v54 = vadd.f32 %v3174_v47, %v3172_v53  ;;  %v3178_v56 = vadd.f32 %v3176_v51, %v1931_v50 }
0x1705   :  { %v3177_v57 = vadd.f32 %v3175_v54, %v1930_v55  ;;  %v3180_v0 = vmul.f32 %v3178_v56, %v4369_v15  ;;  %v3422_v15 = vld [vmem:[#allocation2 + $0x5c0] sm:$0xff] }
0x1707   :  { %v3179_v60 = vmul.f32 %v3177_v57, %v4366_v12  ;;  %v3423_v12 = vld [vmem:[#allocation2 + $0x5d0] sm:$0xff] }
0x1708   :  { %4152 = vmatpush3.msra.mxu1 %v3423_v12 }
0x1709   :  { %4153 = vmatprep.subr.mxu1 %v4308_v6 }
0x170a   :  { %4154 = vmatpush3.msra.mxu1 %v3422_v15 }
0x170b   :  { %4155 = vmatprep.subr.mxu1 %v4308_v6 }
0x170c   :  { %4156 = vmatpush3.msra.mxu1 %v3421_v14 }
0x1732   :  { %v3317_v58 = vpop.permute.xlu1 %3316 }
0x1733   :  { %v3320_v22 = vmul.f32 %v3317_v58, %v4780_v40 }
0x1734   :  { %v3312_v62 = vpop.permute.xlu0 %3311 }
0x1735   :  { %v3319_v29 = vmul.f32 %v3312_v62, %v4777_v31 }
0x1736   :  { %v3326_v59 = vpop.permute.xlu1 %3325 }
0x1737   :  { %v3333_v63 = vmul.f32 %v3326_v59, %v3179_v60 }
0x1739   :  { %v3335_v49 = vadd.f32 %v3333_v63, %v3319_v29 }
0x173a   :  { %v3331_v42 = vpop.permute.xlu1 %3330 }
0x173b   :  { %v3334_v10 = vmul.f32 %v3331_v42, %v3180_v0 }
0x173d   :  { %v3336_v11 = vadd.f32 %v3334_v10, %v3320_v22 }
0x173f   :  { %v4824_v7 = vadd.f32 %v3336_v11, %v3335_v49 }
0x1741   :  { %4139 = vmatmul.mubr.msk.f32.vlgmr.msra.gmra.mxu0 %vm142_vm6, %v4824_v7 }
0x1742   :  { %4168 = vmatprep.mubr.msk.f32.mxu0 %vm4318_vm13, %v4308_v6  ;;  %4161 = vmatpush3.msra.mxu0 %v3507_v17 }
0x1743   :  { %4162 = vmatprep.subr.mxu0 %v4308_v6 }
0x1744   :  { %4163 = vmatpush3.msra.mxu0 %v3506_v36 }
0x1745   :  { %4164 = vmatprep.subr.mxu0 %v4308_v6 }
0x1746   :  { %4165 = vmatpush3.msra.mxu0 %v3505_v21 }
0x1747   :  { %4166 = vmatprep.subr.mxu0 %v4308_v6 }
0x1748   :  { %4167 = vmatpush3.msra.mxu0 %v3504_v16 }
0x1801   :  { %v3416_v8 = vpop.f32.mrf.mxu0 }
0x1802   :  { %v3417_v20 = vadd.f32 %v3416_v8, %v3346_v48 }
0x1803   :  { %v4140_v38 = vpop.f32.mrf.mxu0 }
0x1804   :  { %v3420_v9 = vmax.f32 %v3417_v20, 0.0 }
0x1806   :  { %4158 = vmatmul.mubr.msk.f32.vlgmr.msra.gmra.mxu1 %vm142_vm6, %v3420_v9 }
0x18c6   :  { %v3499_v3 = vpop.f32.mrf.mxu1 }
0x18c7   :  { %v3500_v13 = vadd.f32 %v3499_v3, %v3429_v23 }
0x18c8   :  { %v4159_v24 = vpop.f32.mrf.mxu1 }
0x18c9   :  { %v3503_v4 = vmax.f32 %v3500_v13, 0.0 }
0x18cb   :  { %4169 = vmatmul.mubr.msk.f32.vlgmr.msra.gmra.mxu0 %vm58_vm0, %v3503_v4 }
0x198b   :  { %v3578_v26 = vpop.f32.mrf.mxu0 }
0x198c   :  { %v3579_v30 = vadd.f32 %v3578_v26, %v3508_v18 }
0x198d   :  { %v4170_v32 = vpop.f32.mrf.mxu0 }
0x198e   :  { %v3583_v5 = vsel %vm3582_vm14, %v3579_v30, -inf }
0x198f   :  { %3584 = vmax.xlane.f32.xlu1 %v3583_v5 }
0x19a0   :  { %3595 = vrot.lane.b32.xlu1 %v3179_v60, %s4310_s0 }
0x19a4   :  { %3599 = vrot.lane.b32.xlu1 %v3180_v0, %s4310_s0 }
0x1a18   :  { %v3585_v6 = vpop.xlane.xlu1 %3584 }
0x1a19   :  { %v3586_v19 = vsub.f32 %v3579_v30, %v3585_v6 }
0x1a1b   :  { %v3587_v34 = vmul.f32 1.442695, %v3586_v19 }
0x1a1c   :  { %v3596_v35 = vpop.permute.xlu1 %3595 }
0x1a1d   :  { %4279 = vpow2.f32 %v3587_v34  ;;  %v3607_v25 = vsel %vm142_vm6, %v3606_v2, %v3596_v35 }
0x1a20   :  { %v3600_v37 = vpop.permute.xlu1 %3599 }
0x1a21   :  { %v3609_v39 = vsel %vm3608_vm15, %v3607_v25, %v3600_v37 }
0x1a22   :  { %3613 = vst [vmem:[%s4857_s3] sm:$0xff] %v3609_v39 }
0x1a2a   :  { %v4280_v33 = vpop.eup %4279 }
0x1a2b   :  { %v3589_v41 = vsel %vm3582_vm14, %v4280_v33, 0.0 }
0x1a2c   :  { %3590 = vadd.xlane.f32.xlu0 %v3589_v41 }
0x1ab5   :  { %v3591_v28 = vpop.xlane.xlu0 %3590 }
0x1ab6   :  { %4281 = vrcp.f32 %v3591_v28 }
0x1ac3   :  { %v4282_v61 = vpop.eup %4281 }
0x1ac4   :  { %v3593_v1 = vmul.f32 %v4282_v61, %v4280_v33 }
0x1ac6   :  { %3603 = vrot.lane.b32.xlu0 %v3593_v1, %s4310_s0 }
0x1b38   :  { %v3604_v31 = vpop.permute.xlu0 %3603 }
0x1b39   :  { %v3610_v40 = vsel %vm142_vm6, %v4824_v7, %v3604_v31 }
0x1b3a   :  { %v3612_v43 = vsel %vm3611_vm1, %v3610_v40, 0.0 }
0x1b3b   :  { %3614 = vst [vmem:[%s4857_s3 + $0x8] sm:$0xff] %v3612_v43 }
0x1b3c   :  { %3619 = vsyncpa [#allocation3], 1 }

</bundles_post_ra>
